<compile_context>
chip_gen: v6e
topology: v6e:2x2x1
jax: 0.10.0
libtpu: 0.0.40
codegen_flags: <defaults>
</compile_context>

<pallas_src>
import jax
import jax.numpy as jnp
from jax.experimental import pallas as pl
from jax.experimental.pallas import tpu as pltpu


def add_kernel(a_ref, b_ref, o_ref):
    # Pure VPU elementwise add on the current VMEM tile.
    o_ref[...] = a_ref[...] + b_ref[...]


def pallas_add(x68: jax.Array, x64: jax.Array) -> jax.Array:
    assert x68.shape == x64.shape and x68.dtype == x64.dtype
    orig_shape = x68.shape
    H = orig_shape[-1]

    # Flatten leading dims -> lane-dense 2D slab (S, H); H stays last (fast axis).
    a = x68.reshape(-1, H)
    b = x64.reshape(-1, H)
    S = a.shape[0]

    itemsize = jnp.dtype(a.dtype).itemsize
    slab_bytes = S * H * itemsize
    # Conservative vs the smallest scoped-VMEM default (16 MiB on v5e).
    vmem_budget = 12 * 1024 * 1024

    if 3 * slab_bytes <= vmem_budget:
        # Fast path: whole-array VMEM blocks, no grid, no index_map.
        vmem_spec = pl.BlockSpec(memory_space=pltpu.MemorySpace.VMEM)
        out = pl.pallas_call(
            add_kernel,
            out_shape=jax.ShapeDtypeStruct((S, H), a.dtype),
            in_specs=[vmem_spec, vmem_spec],
            out_specs=vmem_spec,
            input_output_aliases={0: 0},
        )(a, b)
    else:
        # Fallback: row-tiled 1-D grid with the biggest tile that fits a
        # double-buffered (2 inputs + 1 output) VMEM budget.
        bytes_per_row = H * itemsize
        tile_rows = (vmem_budget // (6 * bytes_per_row)) // 8 * 8
        tile_rows = max(8, min(tile_rows, S))
        spec = pl.BlockSpec((tile_rows, H), lambda i: (i, 0))
        out = pl.pallas_call(
            add_kernel,
            out_shape=jax.ShapeDtypeStruct((S, H), a.dtype),
            grid=(pl.cdiv(S, tile_rows),),
            in_specs=[spec, spec],
            out_specs=spec,
            input_output_aliases={0: 0},
            compiler_params=pltpu.CompilerParams(
                dimension_semantics=("parallel",)),
        )(a, b)

    return out.reshape(orig_shape)


if __name__ == "__main__":
    key = jax.random.PRNGKey(0)
    k1, k2 = jax.random.split(key)
    # Shapes implied by the module: (1, 384, 768).
    x68 = jax.random.normal(k1, (1, 384, 768), dtype=jnp.float32)
    x64 = jax.random.normal(k2, (1, 384, 768), dtype=jnp.float32)

    # Reference computed before the (potentially aliasing) kernel call.
    expected = x68 + x64

    result = pallas_add(x68, x64)
    jax.block_until_ready(result)

    assert result.shape == (1, 384, 768)
    assert jnp.allclose(result, expected, atol=1e-6), "mismatch vs reference"
    print("KERNEL_OK")
</pallas_src>

<mosaic_0001>
module attributes {stable_mosaic.version = 11 : i64} {
  func.func @add_kernel(%arg0: memref<384x768xf32, #tpu.memory_space<vmem>>, %arg1: memref<384x768xf32, #tpu.memory_space<vmem>>, %arg2: memref<384x768xf32, #tpu.memory_space<vmem>>) attributes {dimension_semantics = [], scalar_prefetch = 0 : i64, scratch_operands = 0 : i64, tpu.core_type = #tpu.core_type<tc>} {
    %c0 = arith.constant 0 : index
    %c0_0 = arith.constant 0 : index
    %0 = vector.load %arg0[%c0, %c0_0] : memref<384x768xf32, #tpu.memory_space<vmem>>, vector<384x768xf32>
    %c0_1 = arith.constant 0 : index
    %c0_2 = arith.constant 0 : index
    %1 = vector.load %arg1[%c0_1, %c0_2] : memref<384x768xf32, #tpu.memory_space<vmem>>, vector<384x768xf32>
    %2 = arith.addf %0, %1 : vector<384x768xf32>
    %c0_3 = arith.constant 0 : index
    %c0_4 = arith.constant 0 : index
    %3 = vector.load %arg2[%c0_3, %c0_4] : memref<384x768xf32, #tpu.memory_space<vmem>>, vector<384x768xf32>
    tpu.vector_store %arg2[%c0_3, %c0_4], %2 {strides = array<i32>} : memref<384x768xf32, #tpu.memory_space<vmem>>, vector<384x768xf32>,
    return
  }
}

</mosaic_0001>

<bundles_post_ra>
// kernel: tpu_custom_call.1
= control target key start
LH: loop header
LB: loop body
LE: loop exit
PB: predicated region body
PF: predicated region fallthrough
CT: control target
= control target key end

     0   :  { %7 = vsyncpa [#allocation3], 0  ;;  %s2138_s0 = inlined_call_operand.hbm [shape: f32[384,768], index: 0, kind: input, shape index: {}, may-alias: {0,2}]   ;;  %s2139_s1 = inlined_call_operand.vmem [shape: f32[384,768], index: 1, kind: input, shape index: {}]   ;;  %s2140_s2 = inlined_call_operand.hbm [shape: f32[384,768], index: 2, kind: output, shape index: {}, may-alias: {0,2}]  }
   0x1   :  { %8 = vsyncpa [#allocation4], 0  ;;  %s1243_s9 = smov [#allocation2]  }
   0x2   :  { %s14_s10 = sshll.u32 %s1243_s9, 4  ;;  %s15_s10 = int_to_ptr.vmem [resolvable:$true] %s14_s10 }
   0x3   :  { %s1207_s11 = scalar_lea.vmem %s15_s10, 36864  ;;  %p1212_p1 = scmp.lt.s32.totalorder %s15_s10, %s15_s10 }
   0x4   :  { %p1208_p0 = scmp.ne.s32.totalorder %s15_s10, %s1207_s11  ;;  %p1213_p2 = scmp.lt.s32.totalorder %s1207_s11, %s1207_s11 }
   0x6   :  { %p1214_p3 = por %p1213_p2, %p1212_p1 }
   0x8   :  { %p1215_p4 = pnand %p1214_p3, %p1208_p0 }
   0xa   :  { %1218 = shalt.err (!%p1215_p4)
}
   0xb   :  { %s1244_s12 = smov 768   ;;  %s1245_s13 = smov 48  }
   0xc   :  { %20 = dma.hbm_to_vmem [thread:$0]  %s2138_s0, 36864, %s15_s10, [#allocation3], %s1244_s12, %s1244_s12, %s1245_s13  }
   0xd   :  { %1239 = dma.done.wait [#allocation3], 36864  }
   0xe   :  { %1240 = vsyncadd [#allocation3], 4294930432  ;;  %v26_v0 = vld [vmem:[#allocation2] sm:$0xff]  ;;  %v27_v2 = vld [vmem:[#allocation2 + $0x8] sm:$0xff]  ;;  %s1246_s19 = smov [#allocation5]  }
   0xf   :  { %v314_v1 = vld [vmem:[%s2139_s1] sm:$0xff]  ;;  %v315_v4 = vld [vmem:[%s2139_s1 + $0x8] sm:$0xff]  ;;  %v28_v5 = vld [vmem:[#allocation2 + $0x10] sm:$0xff]  ;;  %s1183_s20 = sshll.u32 %s1246_s19, 4  ;;  %s1184_s20 = int_to_ptr.vmem [resolvable:$true] %s1183_s20 }
  0x10   :  { %v602_v3 = vadd.f32 %v314_v1, %v26_v0  ;;  %v316_v6 = vld [vmem:[%s2139_s1 + $0x10] sm:$0xff]  ;;  %v603_v7 = vadd.f32 %v315_v4, %v27_v2  ;;  %v29_v9 = vld [vmem:[#allocation2 + $0x18] sm:$0xff]  ;;  %v30_v11 = vld [vmem:[#allocation2 + $0x20] sm:$0xff]  ;;  %s1219_s26 = scalar_lea.vmem %s1184_s20, 36864  ;;  %p1224_p6 = scmp.lt.s32.totalorder %s1184_s20, %s1184_s20 }
  0x11   :  { %v604_v8 = vadd.f32 %v316_v6, %v28_v5  ;;  %v317_v10 = vld [vmem:[%s2139_s1 + $0x18] sm:$0xff]  ;;  %v318_v13 = vld [vmem:[%s2139_s1 + $0x20] sm:$0xff]  ;;  %v31_v14 = vld [vmem:[#allocation2 + $0x28] sm:$0xff]  ;;  %p1220_p5 = scmp.ne.s32.totalorder %s1184_s20, %s1219_s26  ;;  %p1225_p7 = scmp.lt.s32.totalorder %s1219_s26, %s1219_s26 }
  0x12   :  { %890 = vst [vmem:[#allocation5] sm:$0xff] %v602_v3  ;;  %v605_v12 = vadd.f32 %v317_v10, %v29_v9  ;;  %v319_v15 = vld [vmem:[%s2139_s1 + $0x28] sm:$0xff]  ;;  %891 = vst [vmem:[#allocation5 + $0x8] sm:$0xff] %v603_v7  ;;  %v606_v16 = vadd.f32 %v318_v13, %v30_v11  ;;  %v32_v18 = vld [vmem:[#allocation2 + $0x30] sm:$0xff] }
  0x13   :  { %892 = vst [vmem:[#allocation5 + $0x10] sm:$0xff] %v604_v8  ;;  %v607_v17 = vadd.f32 %v319_v15, %v31_v14  ;;  %v320_v19 = vld [vmem:[%s2139_s1 + $0x30] sm:$0xff]  ;;  %v33_v20 = vld [vmem:[#allocation2 + $0x38] sm:$0xff]  ;;  %v34_v23 = vld [vmem:[#allocation2 + $0x40] sm:$0xff]  ;;  %p1226_p8 = por %p1225_p7, %p1224_p6 }
  0x14   :  { %893 = vst [vmem:[#allocation5 + $0x18] sm:$0xff] %v605_v12  ;;  %v608_v21 = vadd.f32 %v320_v19, %v32_v18  ;;  %v321_v22 = vld [vmem:[%s2139_s1 + $0x38] sm:$0xff]  ;;  %v322_v24 = vld [vmem:[%s2139_s1 + $0x40] sm:$0xff]  ;;  %894 = vst [vmem:[#allocation5 + $0x20] sm:$0xff] %v606_v16 }
  0x15   :  { %895 = vst [vmem:[#allocation5 + $0x28] sm:$0xff] %v607_v17  ;;  %v609_v25 = vadd.f32 %v321_v22, %v33_v20  ;;  %v610_v26 = vadd.f32 %v322_v24, %v34_v23  ;;  %v35_v27 = vld [vmem:[#allocation2 + $0x48] sm:$0xff]  ;;  %v36_v29 = vld [vmem:[#allocation2 + $0x50] sm:$0xff]  ;;  %v37_v32 = vld [vmem:[#allocation2 + $0x58] sm:$0xff]  ;;  %p1227_p9 = pnand %p1226_p8, %p1220_p5 }
  0x16   :  { %v323_v28 = vld [vmem:[%s2139_s1 + $0x48] sm:$0xff]  ;;  %896 = vst [vmem:[#allocation5 + $0x30] sm:$0xff] %v608_v21  ;;  %v324_v31 = vld [vmem:[%s2139_s1 + $0x50] sm:$0xff]  ;;  %v325_v33 = vld [vmem:[%s2139_s1 + $0x58] sm:$0xff] }
  0x17   :  { %v611_v30 = vadd.f32 %v323_v28, %v35_v27  ;;  %897 = vst [vmem:[#allocation5 + $0x38] sm:$0xff] %v609_v25  ;;  %898 = vst [vmem:[#allocation5 + $0x40] sm:$0xff] %v610_v26  ;;  %v612_v34 = vadd.f32 %v324_v31, %v36_v29  ;;  %v613_v35 = vadd.f32 %v325_v33, %v37_v32  ;;  %v38_v36 = vld [vmem:[#allocation2 + $0x60] sm:$0xff]  ;;  %v39_v38 = vld [vmem:[#allocation2 + $0x68] sm:$0xff] }
  0x18   :  { %v326_v37 = vld [vmem:[%s2139_s1 + $0x60] sm:$0xff]  ;;  %v327_v40 = vld [vmem:[%s2139_s1 + $0x68] sm:$0xff]  ;;  %v40_v41 = vld [vmem:[#allocation2 + $0x70] sm:$0xff] }
  0x19   :  { %899 = vst [vmem:[#allocation5 + $0x48] sm:$0xff] %v611_v30  ;;  %v614_v39 = vadd.f32 %v326_v37, %v38_v36  ;;  %v328_v42 = vld [vmem:[%s2139_s1 + $0x70] sm:$0xff]  ;;  %900 = vst [vmem:[#allocation5 + $0x50] sm:$0xff] %v612_v34  ;;  %v615_v43 = vadd.f32 %v327_v40, %v39_v38  ;;  %v41_v45 = vld [vmem:[#allocation2 + $0x78] sm:$0xff] }
  0x1a   :  { %901 = vst [vmem:[#allocation5 + $0x58] sm:$0xff] %v613_v35  ;;  %v616_v44 = vadd.f32 %v328_v42, %v40_v41  ;;  %v329_v46 = vld [vmem:[%s2139_s1 + $0x78] sm:$0xff]  ;;  %v42_v47 = vld [vmem:[#allocation2 + $0x80] sm:$0xff]  ;;  %v43_v50 = vld [vmem:[#allocation2 + $0x88] sm:$0xff] }
  0x1b   :  { %902 = vst [vmem:[#allocation5 + $0x60] sm:$0xff] %v614_v39  ;;  %v617_v48 = vadd.f32 %v329_v46, %v41_v45  ;;  %v330_v49 = vld [vmem:[%s2139_s1 + $0x80] sm:$0xff]  ;;  %v331_v51 = vld [vmem:[%s2139_s1 + $0x88] sm:$0xff]  ;;  %903 = vst [vmem:[#allocation5 + $0x68] sm:$0xff] %v615_v43 }
  0x1c   :  { %904 = vst [vmem:[#allocation5 + $0x70] sm:$0xff] %v616_v44  ;;  %v618_v52 = vadd.f32 %v330_v49, %v42_v47  ;;  %v619_v53 = vadd.f32 %v331_v51, %v43_v50  ;;  %v44_v54 = vld [vmem:[#allocation2 + $0x90] sm:$0xff]  ;;  %v45_v56 = vld [vmem:[#allocation2 + $0x98] sm:$0xff]  ;;  %v46_v59 = vld [vmem:[#allocation2 + $0xa0] sm:$0xff] }
  0x1d   :  { %v332_v55 = vld [vmem:[%s2139_s1 + $0x90] sm:$0xff]  ;;  %905 = vst [vmem:[#allocation5 + $0x78] sm:$0xff] %v617_v48  ;;  %v333_v58 = vld [vmem:[%s2139_s1 + $0x98] sm:$0xff]  ;;  %v334_v60 = vld [vmem:[%s2139_s1 + $0xa0] sm:$0xff] }
  0x1e   :  { %v620_v57 = vadd.f32 %v332_v55, %v44_v54  ;;  %906 = vst [vmem:[#allocation5 + $0x80] sm:$0xff] %v618_v52  ;;  %907 = vst [vmem:[#allocation5 + $0x88] sm:$0xff] %v619_v53  ;;  %v621_v61 = vadd.f32 %v333_v58, %v45_v56  ;;  %v622_v62 = vadd.f32 %v334_v60, %v46_v59  ;;  %v47_v63 = vld [vmem:[#allocation2 + $0xa8] sm:$0xff]  ;;  %v48_v1 = vld [vmem:[#allocation2 + $0xb0] sm:$0xff] }
  0x1f   :  { %v335_v0 = vld [vmem:[%s2139_s1 + $0xa8] sm:$0xff]  ;;  %v336_v3 = vld [vmem:[%s2139_s1 + $0xb0] sm:$0xff]  ;;  %v49_v4 = vld [vmem:[#allocation2 + $0xb8] sm:$0xff] }
  0x20   :  { %908 = vst [vmem:[#allocation5 + $0x90] sm:$0xff] %v620_v57  ;;  %v623_v2 = vadd.f32 %v335_v0, %v47_v63  ;;  %v337_v5 = vld [vmem:[%s2139_s1 + $0xb8] sm:$0xff]  ;;  %909 = vst [vmem:[#allocation5 + $0x98] sm:$0xff] %v621_v61  ;;  %v624_v6 = vadd.f32 %v336_v3, %v48_v1  ;;  %v50_v8 = vld [vmem:[#allocation2 + $0xc0] sm:$0xff] }
  0x21   :  { %910 = vst [vmem:[#allocation5 + $0xa0] sm:$0xff] %v622_v62  ;;  %v625_v7 = vadd.f32 %v337_v5, %v49_v4  ;;  %v338_v9 = vld [vmem:[%s2139_s1 + $0xc0] sm:$0xff]  ;;  %v51_v10 = vld [vmem:[#allocation2 + $0xc8] sm:$0xff]  ;;  %v52_v13 = vld [vmem:[#allocation2 + $0xd0] sm:$0xff] }
  0x22   :  { %911 = vst [vmem:[#allocation5 + $0xa8] sm:$0xff] %v623_v2  ;;  %v626_v11 = vadd.f32 %v338_v9, %v50_v8  ;;  %v339_v12 = vld [vmem:[%s2139_s1 + $0xc8] sm:$0xff]  ;;  %v340_v14 = vld [vmem:[%s2139_s1 + $0xd0] sm:$0xff]  ;;  %912 = vst [vmem:[#allocation5 + $0xb0] sm:$0xff] %v624_v6 }
  0x23   :  { %913 = vst [vmem:[#allocation5 + $0xb8] sm:$0xff] %v625_v7  ;;  %v627_v15 = vadd.f32 %v339_v12, %v51_v10  ;;  %v628_v16 = vadd.f32 %v340_v14, %v52_v13  ;;  %v53_v17 = vld [vmem:[#allocation2 + $0xd8] sm:$0xff]  ;;  %v54_v19 = vld [vmem:[#allocation2 + $0xe0] sm:$0xff]  ;;  %v55_v22 = vld [vmem:[#allocation2 + $0xe8] sm:$0xff] }
  0x24   :  { %v341_v18 = vld [vmem:[%s2139_s1 + $0xd8] sm:$0xff]  ;;  %914 = vst [vmem:[#allocation5 + $0xc0] sm:$0xff] %v626_v11  ;;  %v342_v21 = vld [vmem:[%s2139_s1 + $0xe0] sm:$0xff]  ;;  %v343_v23 = vld [vmem:[%s2139_s1 + $0xe8] sm:$0xff] }
  0x25   :  { %v629_v20 = vadd.f32 %v341_v18, %v53_v17  ;;  %915 = vst [vmem:[#allocation5 + $0xc8] sm:$0xff] %v627_v15  ;;  %916 = vst [vmem:[#allocation5 + $0xd0] sm:$0xff] %v628_v16  ;;  %v630_v24 = vadd.f32 %v342_v21, %v54_v19  ;;  %v631_v25 = vadd.f32 %v343_v23, %v55_v22  ;;  %v56_v26 = vld [vmem:[#allocation2 + $0xf0] sm:$0xff]  ;;  %v57_v28 = vld [vmem:[#allocation2 + $0xf8] sm:$0xff] }
  0x26   :  { %v344_v27 = vld [vmem:[%s2139_s1 + $0xf0] sm:$0xff]  ;;  %v345_v30 = vld [vmem:[%s2139_s1 + $0xf8] sm:$0xff]  ;;  %v58_v31 = vld [vmem:[#allocation2 + $0x100] sm:$0xff] }
  0x27   :  { %917 = vst [vmem:[#allocation5 + $0xd8] sm:$0xff] %v629_v20  ;;  %v632_v29 = vadd.f32 %v344_v27, %v56_v26  ;;  %v346_v32 = vld [vmem:[%s2139_s1 + $0x100] sm:$0xff]  ;;  %918 = vst [vmem:[#allocation5 + $0xe0] sm:$0xff] %v630_v24  ;;  %v633_v33 = vadd.f32 %v345_v30, %v57_v28  ;;  %v59_v35 = vld [vmem:[#allocation2 + $0x108] sm:$0xff] }
  0x28   :  { %919 = vst [vmem:[#allocation5 + $0xe8] sm:$0xff] %v631_v25  ;;  %v634_v34 = vadd.f32 %v346_v32, %v58_v31  ;;  %v347_v36 = vld [vmem:[%s2139_s1 + $0x108] sm:$0xff]  ;;  %v60_v37 = vld [vmem:[#allocation2 + $0x110] sm:$0xff]  ;;  %v61_v40 = vld [vmem:[#allocation2 + $0x118] sm:$0xff] }
  0x29   :  { %920 = vst [vmem:[#allocation5 + $0xf0] sm:$0xff] %v632_v29  ;;  %v635_v38 = vadd.f32 %v347_v36, %v59_v35  ;;  %v348_v39 = vld [vmem:[%s2139_s1 + $0x110] sm:$0xff]  ;;  %v349_v41 = vld [vmem:[%s2139_s1 + $0x118] sm:$0xff]  ;;  %921 = vst [vmem:[#allocation5 + $0xf8] sm:$0xff] %v633_v33 }
  0x2a   :  { %922 = vst [vmem:[#allocation5 + $0x100] sm:$0xff] %v634_v34  ;;  %v636_v42 = vadd.f32 %v348_v39, %v60_v37  ;;  %v637_v43 = vadd.f32 %v349_v41, %v61_v40  ;;  %v62_v44 = vld [vmem:[#allocation2 + $0x120] sm:$0xff]  ;;  %v63_v46 = vld [vmem:[#allocation2 + $0x128] sm:$0xff]  ;;  %v64_v49 = vld [vmem:[#allocation2 + $0x130] sm:$0xff] }
  0x2b   :  { %v350_v45 = vld [vmem:[%s2139_s1 + $0x120] sm:$0xff]  ;;  %923 = vst [vmem:[#allocation5 + $0x108] sm:$0xff] %v635_v38  ;;  %v351_v48 = vld [vmem:[%s2139_s1 + $0x128] sm:$0xff]  ;;  %v352_v50 = vld [vmem:[%s2139_s1 + $0x130] sm:$0xff] }
  0x2c   :  { %v638_v47 = vadd.f32 %v350_v45, %v62_v44  ;;  %924 = vst [vmem:[#allocation5 + $0x110] sm:$0xff] %v636_v42  ;;  %925 = vst [vmem:[#allocation5 + $0x118] sm:$0xff] %v637_v43  ;;  %v639_v51 = vadd.f32 %v351_v48, %v63_v46  ;;  %v640_v52 = vadd.f32 %v352_v50, %v64_v49  ;;  %v65_v53 = vld [vmem:[#allocation2 + $0x138] sm:$0xff]  ;;  %v66_v55 = vld [vmem:[#allocation2 + $0x140] sm:$0xff] }
  0x2d   :  { %v353_v54 = vld [vmem:[%s2139_s1 + $0x138] sm:$0xff]  ;;  %v354_v57 = vld [vmem:[%s2139_s1 + $0x140] sm:$0xff]  ;;  %v67_v58 = vld [vmem:[#allocation2 + $0x148] sm:$0xff] }
  0x2e   :  { %926 = vst [vmem:[#allocation5 + $0x120] sm:$0xff] %v638_v47  ;;  %v641_v56 = vadd.f32 %v353_v54, %v65_v53  ;;  %v355_v59 = vld [vmem:[%s2139_s1 + $0x148] sm:$0xff]  ;;  %927 = vst [vmem:[#allocation5 + $0x128] sm:$0xff] %v639_v51  ;;  %v642_v60 = vadd.f32 %v354_v57, %v66_v55  ;;  %v68_v62 = vld [vmem:[#allocation2 + $0x150] sm:$0xff] }
  0x2f   :  { %928 = vst [vmem:[#allocation5 + $0x130] sm:$0xff] %v640_v52  ;;  %v643_v61 = vadd.f32 %v355_v59, %v67_v58  ;;  %v356_v63 = vld [vmem:[%s2139_s1 + $0x150] sm:$0xff]  ;;  %v69_v0 = vld [vmem:[#allocation2 + $0x158] sm:$0xff]  ;;  %v70_v3 = vld [vmem:[#allocation2 + $0x160] sm:$0xff] }
  0x30   :  { %929 = vst [vmem:[#allocation5 + $0x138] sm:$0xff] %v641_v56  ;;  %v644_v1 = vadd.f32 %v356_v63, %v68_v62  ;;  %v357_v2 = vld [vmem:[%s2139_s1 + $0x158] sm:$0xff]  ;;  %v358_v4 = vld [vmem:[%s2139_s1 + $0x160] sm:$0xff]  ;;  %930 = vst [vmem:[#allocation5 + $0x140] sm:$0xff] %v642_v60 }
  0x31   :  { %931 = vst [vmem:[#allocation5 + $0x148] sm:$0xff] %v643_v61  ;;  %v645_v5 = vadd.f32 %v357_v2, %v69_v0  ;;  %v646_v6 = vadd.f32 %v358_v4, %v70_v3  ;;  %v71_v7 = vld [vmem:[#allocation2 + $0x168] sm:$0xff]  ;;  %v72_v9 = vld [vmem:[#allocation2 + $0x170] sm:$0xff]  ;;  %v73_v12 = vld [vmem:[#allocation2 + $0x178] sm:$0xff] }
  0x32   :  { %v359_v8 = vld [vmem:[%s2139_s1 + $0x168] sm:$0xff]  ;;  %932 = vst [vmem:[#allocation5 + $0x150] sm:$0xff] %v644_v1  ;;  %v360_v11 = vld [vmem:[%s2139_s1 + $0x170] sm:$0xff]  ;;  %v361_v13 = vld [vmem:[%s2139_s1 + $0x178] sm:$0xff] }
  0x33   :  { %v647_v10 = vadd.f32 %v359_v8, %v71_v7  ;;  %933 = vst [vmem:[#allocation5 + $0x158] sm:$0xff] %v645_v5  ;;  %934 = vst [vmem:[#allocation5 + $0x160] sm:$0xff] %v646_v6  ;;  %v648_v14 = vadd.f32 %v360_v11, %v72_v9  ;;  %v649_v15 = vadd.f32 %v361_v13, %v73_v12  ;;  %v74_v16 = vld [vmem:[#allocation2 + $0x180] sm:$0xff]  ;;  %v75_v18 = vld [vmem:[#allocation2 + $0x188] sm:$0xff] }
  0x34   :  { %v362_v17 = vld [vmem:[%s2139_s1 + $0x180] sm:$0xff]  ;;  %v363_v20 = vld [vmem:[%s2139_s1 + $0x188] sm:$0xff]  ;;  %v76_v21 = vld [vmem:[#allocation2 + $0x190] sm:$0xff] }
  0x35   :  { %935 = vst [vmem:[#allocation5 + $0x168] sm:$0xff] %v647_v10  ;;  %v650_v19 = vadd.f32 %v362_v17, %v74_v16  ;;  %v364_v22 = vld [vmem:[%s2139_s1 + $0x190] sm:$0xff]  ;;  %936 = vst [vmem:[#allocation5 + $0x170] sm:$0xff] %v648_v14  ;;  %v651_v23 = vadd.f32 %v363_v20, %v75_v18  ;;  %v77_v25 = vld [vmem:[#allocation2 + $0x198] sm:$0xff] }
  0x36   :  { %937 = vst [vmem:[#allocation5 + $0x178] sm:$0xff] %v649_v15  ;;  %v652_v24 = vadd.f32 %v364_v22, %v76_v21  ;;  %v365_v26 = vld [vmem:[%s2139_s1 + $0x198] sm:$0xff]  ;;  %v78_v27 = vld [vmem:[#allocation2 + $0x1a0] sm:$0xff]  ;;  %v79_v30 = vld [vmem:[#allocation2 + $0x1a8] sm:$0xff] }
  0x37   :  { %938 = vst [vmem:[#allocation5 + $0x180] sm:$0xff] %v650_v19  ;;  %v653_v28 = vadd.f32 %v365_v26, %v77_v25  ;;  %v366_v29 = vld [vmem:[%s2139_s1 + $0x1a0] sm:$0xff]  ;;  %v367_v31 = vld [vmem:[%s2139_s1 + $0x1a8] sm:$0xff]  ;;  %939 = vst [vmem:[#allocation5 + $0x188] sm:$0xff] %v651_v23 }
  0x38   :  { %940 = vst [vmem:[#allocation5 + $0x190] sm:$0xff] %v652_v24  ;;  %v654_v32 = vadd.f32 %v366_v29, %v78_v27  ;;  %v655_v33 = vadd.f32 %v367_v31, %v79_v30  ;;  %v80_v34 = vld [vmem:[#allocation2 + $0x1b0] sm:$0xff]  ;;  %v81_v36 = vld [vmem:[#allocation2 + $0x1b8] sm:$0xff]  ;;  %v82_v39 = vld [vmem:[#allocation2 + $0x1c0] sm:$0xff] }
  0x39   :  { %v368_v35 = vld [vmem:[%s2139_s1 + $0x1b0] sm:$0xff]  ;;  %941 = vst [vmem:[#allocation5 + $0x198] sm:$0xff] %v653_v28  ;;  %v369_v38 = vld [vmem:[%s2139_s1 + $0x1b8] sm:$0xff]  ;;  %v370_v40 = vld [vmem:[%s2139_s1 + $0x1c0] sm:$0xff] }
  0x3a   :  { %v656_v37 = vadd.f32 %v368_v35, %v80_v34  ;;  %942 = vst [vmem:[#allocation5 + $0x1a0] sm:$0xff] %v654_v32  ;;  %943 = vst [vmem:[#allocation5 + $0x1a8] sm:$0xff] %v655_v33  ;;  %v657_v41 = vadd.f32 %v369_v38, %v81_v36  ;;  %v658_v42 = vadd.f32 %v370_v40, %v82_v39  ;;  %v83_v43 = vld [vmem:[#allocation2 + $0x1c8] sm:$0xff]  ;;  %v84_v45 = vld [vmem:[#allocation2 + $0x1d0] sm:$0xff] }
  0x3b   :  { %v371_v44 = vld [vmem:[%s2139_s1 + $0x1c8] sm:$0xff]  ;;  %v372_v47 = vld [vmem:[%s2139_s1 + $0x1d0] sm:$0xff]  ;;  %v85_v48 = vld [vmem:[#allocation2 + $0x1d8] sm:$0xff] }
  0x3c   :  { %944 = vst [vmem:[#allocation5 + $0x1b0] sm:$0xff] %v656_v37  ;;  %v659_v46 = vadd.f32 %v371_v44, %v83_v43  ;;  %v373_v49 = vld [vmem:[%s2139_s1 + $0x1d8] sm:$0xff]  ;;  %945 = vst [vmem:[#allocation5 + $0x1b8] sm:$0xff] %v657_v41  ;;  %v660_v50 = vadd.f32 %v372_v47, %v84_v45  ;;  %v86_v52 = vld [vmem:[#allocation2 + $0x1e0] sm:$0xff] }
  0x3d   :  { %946 = vst [vmem:[#allocation5 + $0x1c0] sm:$0xff] %v658_v42  ;;  %v661_v51 = vadd.f32 %v373_v49, %v85_v48  ;;  %v374_v53 = vld [vmem:[%s2139_s1 + $0x1e0] sm:$0xff]  ;;  %v87_v54 = vld [vmem:[#allocation2 + $0x1e8] sm:$0xff]  ;;  %v88_v57 = vld [vmem:[#allocation2 + $0x1f0] sm:$0xff] }
  0x3e   :  { %947 = vst [vmem:[#allocation5 + $0x1c8] sm:$0xff] %v659_v46  ;;  %v662_v55 = vadd.f32 %v374_v53, %v86_v52  ;;  %v375_v56 = vld [vmem:[%s2139_s1 + $0x1e8] sm:$0xff]  ;;  %v376_v58 = vld [vmem:[%s2139_s1 + $0x1f0] sm:$0xff]  ;;  %948 = vst [vmem:[#allocation5 + $0x1d0] sm:$0xff] %v660_v50 }
  0x3f   :  { %949 = vst [vmem:[#allocation5 + $0x1d8] sm:$0xff] %v661_v51  ;;  %v663_v59 = vadd.f32 %v375_v56, %v87_v54  ;;  %v664_v60 = vadd.f32 %v376_v58, %v88_v57  ;;  %v89_v61 = vld [vmem:[#allocation2 + $0x1f8] sm:$0xff]  ;;  %v90_v63 = vld [vmem:[#allocation2 + $0x200] sm:$0xff]  ;;  %v91_v2 = vld [vmem:[#allocation2 + $0x208] sm:$0xff] }
  0x40   :  { %v377_v62 = vld [vmem:[%s2139_s1 + $0x1f8] sm:$0xff]  ;;  %950 = vst [vmem:[#allocation5 + $0x1e0] sm:$0xff] %v662_v55  ;;  %v378_v1 = vld [vmem:[%s2139_s1 + $0x200] sm:$0xff]  ;;  %v379_v3 = vld [vmem:[%s2139_s1 + $0x208] sm:$0xff] }
  0x41   :  { %v665_v0 = vadd.f32 %v377_v62, %v89_v61  ;;  %951 = vst [vmem:[#allocation5 + $0x1e8] sm:$0xff] %v663_v59  ;;  %952 = vst [vmem:[#allocation5 + $0x1f0] sm:$0xff] %v664_v60  ;;  %v666_v4 = vadd.f32 %v378_v1, %v90_v63  ;;  %v667_v5 = vadd.f32 %v379_v3, %v91_v2  ;;  %v92_v6 = vld [vmem:[#allocation2 + $0x210] sm:$0xff]  ;;  %v93_v8 = vld [vmem:[#allocation2 + $0x218] sm:$0xff] }
  0x42   :  { %v380_v7 = vld [vmem:[%s2139_s1 + $0x210] sm:$0xff]  ;;  %v381_v10 = vld [vmem:[%s2139_s1 + $0x218] sm:$0xff]  ;;  %v94_v11 = vld [vmem:[#allocation2 + $0x220] sm:$0xff] }
  0x43   :  { %953 = vst [vmem:[#allocation5 + $0x1f8] sm:$0xff] %v665_v0  ;;  %v668_v9 = vadd.f32 %v380_v7, %v92_v6  ;;  %v382_v12 = vld [vmem:[%s2139_s1 + $0x220] sm:$0xff]  ;;  %954 = vst [vmem:[#allocation5 + $0x200] sm:$0xff] %v666_v4  ;;  %v669_v13 = vadd.f32 %v381_v10, %v93_v8  ;;  %v95_v15 = vld [vmem:[#allocation2 + $0x228] sm:$0xff] }
  0x44   :  { %955 = vst [vmem:[#allocation5 + $0x208] sm:$0xff] %v667_v5  ;;  %v670_v14 = vadd.f32 %v382_v12, %v94_v11  ;;  %v383_v16 = vld [vmem:[%s2139_s1 + $0x228] sm:$0xff]  ;;  %v96_v17 = vld [vmem:[#allocation2 + $0x230] sm:$0xff]  ;;  %v97_v20 = vld [vmem:[#allocation2 + $0x238] sm:$0xff] }
  0x45   :  { %956 = vst [vmem:[#allocation5 + $0x210] sm:$0xff] %v668_v9  ;;  %v671_v18 = vadd.f32 %v383_v16, %v95_v15  ;;  %v384_v19 = vld [vmem:[%s2139_s1 + $0x230] sm:$0xff]  ;;  %v385_v21 = vld [vmem:[%s2139_s1 + $0x238] sm:$0xff]  ;;  %957 = vst [vmem:[#allocation5 + $0x218] sm:$0xff] %v669_v13 }
  0x46   :  { %958 = vst [vmem:[#allocation5 + $0x220] sm:$0xff] %v670_v14  ;;  %v672_v22 = vadd.f32 %v384_v19, %v96_v17  ;;  %v673_v23 = vadd.f32 %v385_v21, %v97_v20  ;;  %v98_v24 = vld [vmem:[#allocation2 + $0x240] sm:$0xff]  ;;  %v99_v26 = vld [vmem:[#allocation2 + $0x248] sm:$0xff]  ;;  %v100_v29 = vld [vmem:[#allocation2 + $0x250] sm:$0xff] }
  0x47   :  { %v386_v25 = vld [vmem:[%s2139_s1 + $0x240] sm:$0xff]  ;;  %959 = vst [vmem:[#allocation5 + $0x228] sm:$0xff] %v671_v18  ;;  %v387_v28 = vld [vmem:[%s2139_s1 + $0x248] sm:$0xff]  ;;  %v388_v30 = vld [vmem:[%s2139_s1 + $0x250] sm:$0xff] }
  0x48   :  { %v674_v27 = vadd.f32 %v386_v25, %v98_v24  ;;  %960 = vst [vmem:[#allocation5 + $0x230] sm:$0xff] %v672_v22  ;;  %961 = vst [vmem:[#allocation5 + $0x238] sm:$0xff] %v673_v23  ;;  %v675_v31 = vadd.f32 %v387_v28, %v99_v26  ;;  %v676_v32 = vadd.f32 %v388_v30, %v100_v29  ;;  %v101_v33 = vld [vmem:[#allocation2 + $0x258] sm:$0xff]  ;;  %v102_v35 = vld [vmem:[#allocation2 + $0x260] sm:$0xff] }
  0x49   :  { %v389_v34 = vld [vmem:[%s2139_s1 + $0x258] sm:$0xff]  ;;  %v390_v37 = vld [vmem:[%s2139_s1 + $0x260] sm:$0xff]  ;;  %v103_v38 = vld [vmem:[#allocation2 + $0x268] sm:$0xff] }
  0x4a   :  { %962 = vst [vmem:[#allocation5 + $0x240] sm:$0xff] %v674_v27  ;;  %v677_v36 = vadd.f32 %v389_v34, %v101_v33  ;;  %v391_v39 = vld [vmem:[%s2139_s1 + $0x268] sm:$0xff]  ;;  %963 = vst [vmem:[#allocation5 + $0x248] sm:$0xff] %v675_v31  ;;  %v678_v40 = vadd.f32 %v390_v37, %v102_v35  ;;  %v104_v42 = vld [vmem:[#allocation2 + $0x270] sm:$0xff] }
  0x4b   :  { %964 = vst [vmem:[#allocation5 + $0x250] sm:$0xff] %v676_v32  ;;  %v679_v41 = vadd.f32 %v391_v39, %v103_v38  ;;  %v392_v43 = vld [vmem:[%s2139_s1 + $0x270] sm:$0xff]  ;;  %v105_v44 = vld [vmem:[#allocation2 + $0x278] sm:$0xff]  ;;  %v106_v47 = vld [vmem:[#allocation2 + $0x280] sm:$0xff] }
  0x4c   :  { %965 = vst [vmem:[#allocation5 + $0x258] sm:$0xff] %v677_v36  ;;  %v680_v45 = vadd.f32 %v392_v43, %v104_v42  ;;  %v393_v46 = vld [vmem:[%s2139_s1 + $0x278] sm:$0xff]  ;;  %v394_v48 = vld [vmem:[%s2139_s1 + $0x280] sm:$0xff]  ;;  %966 = vst [vmem:[#allocation5 + $0x260] sm:$0xff] %v678_v40 }
  0x4d   :  { %967 = vst [vmem:[#allocation5 + $0x268] sm:$0xff] %v679_v41  ;;  %v681_v49 = vadd.f32 %v393_v46, %v105_v44  ;;  %v682_v50 = vadd.f32 %v394_v48, %v106_v47  ;;  %v107_v51 = vld [vmem:[#allocation2 + $0x288] sm:$0xff]  ;;  %v108_v53 = vld [vmem:[#allocation2 + $0x290] sm:$0xff]  ;;  %v109_v56 = vld [vmem:[#allocation2 + $0x298] sm:$0xff] }
  0x4e   :  { %v395_v52 = vld [vmem:[%s2139_s1 + $0x288] sm:$0xff]  ;;  %968 = vst [vmem:[#allocation5 + $0x270] sm:$0xff] %v680_v45  ;;  %v396_v55 = vld [vmem:[%s2139_s1 + $0x290] sm:$0xff]  ;;  %v397_v57 = vld [vmem:[%s2139_s1 + $0x298] sm:$0xff] }
  0x4f   :  { %v683_v54 = vadd.f32 %v395_v52, %v107_v51  ;;  %969 = vst [vmem:[#allocation5 + $0x278] sm:$0xff] %v681_v49  ;;  %970 = vst [vmem:[#allocation5 + $0x280] sm:$0xff] %v682_v50  ;;  %v684_v58 = vadd.f32 %v396_v55, %v108_v53  ;;  %v685_v59 = vadd.f32 %v397_v57, %v109_v56  ;;  %v110_v60 = vld [vmem:[#allocation2 + $0x2a0] sm:$0xff]  ;;  %v111_v62 = vld [vmem:[#allocation2 + $0x2a8] sm:$0xff] }
  0x50   :  { %v398_v61 = vld [vmem:[%s2139_s1 + $0x2a0] sm:$0xff]  ;;  %v399_v0 = vld [vmem:[%s2139_s1 + $0x2a8] sm:$0xff]  ;;  %v112_v1 = vld [vmem:[#allocation2 + $0x2b0] sm:$0xff] }
  0x51   :  { %971 = vst [vmem:[#allocation5 + $0x288] sm:$0xff] %v683_v54  ;;  %v686_v63 = vadd.f32 %v398_v61, %v110_v60  ;;  %v400_v2 = vld [vmem:[%s2139_s1 + $0x2b0] sm:$0xff]  ;;  %972 = vst [vmem:[#allocation5 + $0x290] sm:$0xff] %v684_v58  ;;  %v687_v3 = vadd.f32 %v399_v0, %v111_v62  ;;  %v113_v5 = vld [vmem:[#allocation2 + $0x2b8] sm:$0xff] }
  0x52   :  { %973 = vst [vmem:[#allocation5 + $0x298] sm:$0xff] %v685_v59  ;;  %v688_v4 = vadd.f32 %v400_v2, %v112_v1  ;;  %v401_v6 = vld [vmem:[%s2139_s1 + $0x2b8] sm:$0xff]  ;;  %v114_v7 = vld [vmem:[#allocation2 + $0x2c0] sm:$0xff]  ;;  %v115_v10 = vld [vmem:[#allocation2 + $0x2c8] sm:$0xff] }
  0x53   :  { %974 = vst [vmem:[#allocation5 + $0x2a0] sm:$0xff] %v686_v63  ;;  %v689_v8 = vadd.f32 %v401_v6, %v113_v5  ;;  %v402_v9 = vld [vmem:[%s2139_s1 + $0x2c0] sm:$0xff]  ;;  %v403_v11 = vld [vmem:[%s2139_s1 + $0x2c8] sm:$0xff]  ;;  %975 = vst [vmem:[#allocation5 + $0x2a8] sm:$0xff] %v687_v3 }
  0x54   :  { %976 = vst [vmem:[#allocation5 + $0x2b0] sm:$0xff] %v688_v4  ;;  %v690_v12 = vadd.f32 %v402_v9, %v114_v7  ;;  %v691_v13 = vadd.f32 %v403_v11, %v115_v10  ;;  %v116_v14 = vld [vmem:[#allocation2 + $0x2d0] sm:$0xff]  ;;  %v117_v16 = vld [vmem:[#allocation2 + $0x2d8] sm:$0xff]  ;;  %v118_v19 = vld [vmem:[#allocation2 + $0x2e0] sm:$0xff] }
  0x55   :  { %v404_v15 = vld [vmem:[%s2139_s1 + $0x2d0] sm:$0xff]  ;;  %977 = vst [vmem:[#allocation5 + $0x2b8] sm:$0xff] %v689_v8  ;;  %v405_v18 = vld [vmem:[%s2139_s1 + $0x2d8] sm:$0xff]  ;;  %v406_v20 = vld [vmem:[%s2139_s1 + $0x2e0] sm:$0xff] }
  0x56   :  { %v692_v17 = vadd.f32 %v404_v15, %v116_v14  ;;  %978 = vst [vmem:[#allocation5 + $0x2c0] sm:$0xff] %v690_v12  ;;  %979 = vst [vmem:[#allocation5 + $0x2c8] sm:$0xff] %v691_v13  ;;  %v693_v21 = vadd.f32 %v405_v18, %v117_v16  ;;  %v694_v22 = vadd.f32 %v406_v20, %v118_v19  ;;  %v119_v23 = vld [vmem:[#allocation2 + $0x2e8] sm:$0xff]  ;;  %v120_v25 = vld [vmem:[#allocation2 + $0x2f0] sm:$0xff] }
  0x57   :  { %v407_v24 = vld [vmem:[%s2139_s1 + $0x2e8] sm:$0xff]  ;;  %v408_v27 = vld [vmem:[%s2139_s1 + $0x2f0] sm:$0xff]  ;;  %v121_v28 = vld [vmem:[#allocation2 + $0x2f8] sm:$0xff] }
  0x58   :  { %980 = vst [vmem:[#allocation5 + $0x2d0] sm:$0xff] %v692_v17  ;;  %v695_v26 = vadd.f32 %v407_v24, %v119_v23  ;;  %v409_v29 = vld [vmem:[%s2139_s1 + $0x2f8] sm:$0xff]  ;;  %981 = vst [vmem:[#allocation5 + $0x2d8] sm:$0xff] %v693_v21  ;;  %v696_v30 = vadd.f32 %v408_v27, %v120_v25  ;;  %v122_v32 = vld [vmem:[#allocation2 + $0x300] sm:$0xff] }
  0x59   :  { %982 = vst [vmem:[#allocation5 + $0x2e0] sm:$0xff] %v694_v22  ;;  %v697_v31 = vadd.f32 %v409_v29, %v121_v28  ;;  %v410_v33 = vld [vmem:[%s2139_s1 + $0x300] sm:$0xff]  ;;  %v123_v34 = vld [vmem:[#allocation2 + $0x308] sm:$0xff]  ;;  %v124_v37 = vld [vmem:[#allocation2 + $0x310] sm:$0xff] }
  0x5a   :  { %983 = vst [vmem:[#allocation5 + $0x2e8] sm:$0xff] %v695_v26  ;;  %v698_v35 = vadd.f32 %v410_v33, %v122_v32  ;;  %v411_v36 = vld [vmem:[%s2139_s1 + $0x308] sm:$0xff]  ;;  %v412_v38 = vld [vmem:[%s2139_s1 + $0x310] sm:$0xff]  ;;  %984 = vst [vmem:[#allocation5 + $0x2f0] sm:$0xff] %v696_v30 }
  0x5b   :  { %985 = vst [vmem:[#allocation5 + $0x2f8] sm:$0xff] %v697_v31  ;;  %v699_v39 = vadd.f32 %v411_v36, %v123_v34  ;;  %v700_v40 = vadd.f32 %v412_v38, %v124_v37  ;;  %v125_v41 = vld [vmem:[#allocation2 + $0x318] sm:$0xff]  ;;  %v126_v43 = vld [vmem:[#allocation2 + $0x320] sm:$0xff]  ;;  %v127_v46 = vld [vmem:[#allocation2 + $0x328] sm:$0xff] }
  0x5c   :  { %v413_v42 = vld [vmem:[%s2139_s1 + $0x318] sm:$0xff]  ;;  %986 = vst [vmem:[#allocation5 + $0x300] sm:$0xff] %v698_v35  ;;  %v414_v45 = vld [vmem:[%s2139_s1 + $0x320] sm:$0xff]  ;;  %v415_v47 = vld [vmem:[%s2139_s1 + $0x328] sm:$0xff] }
  0x5d   :  { %v701_v44 = vadd.f32 %v413_v42, %v125_v41  ;;  %987 = vst [vmem:[#allocation5 + $0x308] sm:$0xff] %v699_v39  ;;  %988 = vst [vmem:[#allocation5 + $0x310] sm:$0xff] %v700_v40  ;;  %v702_v48 = vadd.f32 %v414_v45, %v126_v43  ;;  %v703_v49 = vadd.f32 %v415_v47, %v127_v46  ;;  %v128_v50 = vld [vmem:[#allocation2 + $0x330] sm:$0xff]  ;;  %v129_v52 = vld [vmem:[#allocation2 + $0x338] sm:$0xff] }
  0x5e   :  { %v416_v51 = vld [vmem:[%s2139_s1 + $0x330] sm:$0xff]  ;;  %v417_v54 = vld [vmem:[%s2139_s1 + $0x338] sm:$0xff]  ;;  %v130_v55 = vld [vmem:[#allocation2 + $0x340] sm:$0xff] }
  0x5f   :  { %989 = vst [vmem:[#allocation5 + $0x318] sm:$0xff] %v701_v44  ;;  %v704_v53 = vadd.f32 %v416_v51, %v128_v50  ;;  %v418_v56 = vld [vmem:[%s2139_s1 + $0x340] sm:$0xff]  ;;  %990 = vst [vmem:[#allocation5 + $0x320] sm:$0xff] %v702_v48  ;;  %v705_v57 = vadd.f32 %v417_v54, %v129_v52  ;;  %v131_v59 = vld [vmem:[#allocation2 + $0x348] sm:$0xff] }
  0x60   :  { %991 = vst [vmem:[#allocation5 + $0x328] sm:$0xff] %v703_v49  ;;  %v706_v58 = vadd.f32 %v418_v56, %v130_v55  ;;  %v419_v60 = vld [vmem:[%s2139_s1 + $0x348] sm:$0xff]  ;;  %v132_v61 = vld [vmem:[#allocation2 + $0x350] sm:$0xff]  ;;  %v133_v0 = vld [vmem:[#allocation2 + $0x358] sm:$0xff] }
  0x61   :  { %992 = vst [vmem:[#allocation5 + $0x330] sm:$0xff] %v704_v53  ;;  %v707_v62 = vadd.f32 %v419_v60, %v131_v59  ;;  %v420_v63 = vld [vmem:[%s2139_s1 + $0x350] sm:$0xff]  ;;  %v421_v1 = vld [vmem:[%s2139_s1 + $0x358] sm:$0xff]  ;;  %993 = vst [vmem:[#allocation5 + $0x338] sm:$0xff] %v705_v57 }
  0x62   :  { %994 = vst [vmem:[#allocation5 + $0x340] sm:$0xff] %v706_v58  ;;  %v708_v2 = vadd.f32 %v420_v63, %v132_v61  ;;  %v709_v3 = vadd.f32 %v421_v1, %v133_v0  ;;  %v134_v4 = vld [vmem:[#allocation2 + $0x360] sm:$0xff]  ;;  %v135_v6 = vld [vmem:[#allocation2 + $0x368] sm:$0xff]  ;;  %v136_v9 = vld [vmem:[#allocation2 + $0x370] sm:$0xff] }
  0x63   :  { %v422_v5 = vld [vmem:[%s2139_s1 + $0x360] sm:$0xff]  ;;  %995 = vst [vmem:[#allocation5 + $0x348] sm:$0xff] %v707_v62  ;;  %v423_v8 = vld [vmem:[%s2139_s1 + $0x368] sm:$0xff]  ;;  %v424_v10 = vld [vmem:[%s2139_s1 + $0x370] sm:$0xff] }
  0x64   :  { %v710_v7 = vadd.f32 %v422_v5, %v134_v4  ;;  %996 = vst [vmem:[#allocation5 + $0x350] sm:$0xff] %v708_v2  ;;  %997 = vst [vmem:[#allocation5 + $0x358] sm:$0xff] %v709_v3  ;;  %v711_v11 = vadd.f32 %v423_v8, %v135_v6  ;;  %v712_v12 = vadd.f32 %v424_v10, %v136_v9  ;;  %v137_v13 = vld [vmem:[#allocation2 + $0x378] sm:$0xff]  ;;  %v138_v15 = vld [vmem:[#allocation2 + $0x380] sm:$0xff] }
  0x65   :  { %v425_v14 = vld [vmem:[%s2139_s1 + $0x378] sm:$0xff]  ;;  %v426_v17 = vld [vmem:[%s2139_s1 + $0x380] sm:$0xff]  ;;  %v139_v18 = vld [vmem:[#allocation2 + $0x388] sm:$0xff] }
  0x66   :  { %998 = vst [vmem:[#allocation5 + $0x360] sm:$0xff] %v710_v7  ;;  %v713_v16 = vadd.f32 %v425_v14, %v137_v13  ;;  %v427_v19 = vld [vmem:[%s2139_s1 + $0x388] sm:$0xff]  ;;  %999 = vst [vmem:[#allocation5 + $0x368] sm:$0xff] %v711_v11  ;;  %v714_v20 = vadd.f32 %v426_v17, %v138_v15  ;;  %v140_v22 = vld [vmem:[#allocation2 + $0x390] sm:$0xff] }
  0x67   :  { %1000 = vst [vmem:[#allocation5 + $0x370] sm:$0xff] %v712_v12  ;;  %v715_v21 = vadd.f32 %v427_v19, %v139_v18  ;;  %v428_v23 = vld [vmem:[%s2139_s1 + $0x390] sm:$0xff]  ;;  %v141_v24 = vld [vmem:[#allocation2 + $0x398] sm:$0xff]  ;;  %v142_v27 = vld [vmem:[#allocation2 + $0x3a0] sm:$0xff] }
  0x68   :  { %1001 = vst [vmem:[#allocation5 + $0x378] sm:$0xff] %v713_v16  ;;  %v716_v25 = vadd.f32 %v428_v23, %v140_v22  ;;  %v429_v26 = vld [vmem:[%s2139_s1 + $0x398] sm:$0xff]  ;;  %v430_v28 = vld [vmem:[%s2139_s1 + $0x3a0] sm:$0xff]  ;;  %1002 = vst [vmem:[#allocation5 + $0x380] sm:$0xff] %v714_v20 }
  0x69   :  { %1003 = vst [vmem:[#allocation5 + $0x388] sm:$0xff] %v715_v21  ;;  %v717_v29 = vadd.f32 %v429_v26, %v141_v24  ;;  %v718_v30 = vadd.f32 %v430_v28, %v142_v27  ;;  %v143_v31 = vld [vmem:[#allocation2 + $0x3a8] sm:$0xff]  ;;  %v144_v33 = vld [vmem:[#allocation2 + $0x3b0] sm:$0xff]  ;;  %v145_v36 = vld [vmem:[#allocation2 + $0x3b8] sm:$0xff] }
  0x6a   :  { %v431_v32 = vld [vmem:[%s2139_s1 + $0x3a8] sm:$0xff]  ;;  %1004 = vst [vmem:[#allocation5 + $0x390] sm:$0xff] %v716_v25  ;;  %v432_v35 = vld [vmem:[%s2139_s1 + $0x3b0] sm:$0xff]  ;;  %v433_v37 = vld [vmem:[%s2139_s1 + $0x3b8] sm:$0xff] }
  0x6b   :  { %v719_v34 = vadd.f32 %v431_v32, %v143_v31  ;;  %1005 = vst [vmem:[#allocation5 + $0x398] sm:$0xff] %v717_v29  ;;  %1006 = vst [vmem:[#allocation5 + $0x3a0] sm:$0xff] %v718_v30  ;;  %v720_v38 = vadd.f32 %v432_v35, %v144_v33  ;;  %v721_v39 = vadd.f32 %v433_v37, %v145_v36  ;;  %v146_v40 = vld [vmem:[#allocation2 + $0x3c0] sm:$0xff]  ;;  %v147_v42 = vld [vmem:[#allocation2 + $0x3c8] sm:$0xff] }
  0x6c   :  { %v434_v41 = vld [vmem:[%s2139_s1 + $0x3c0] sm:$0xff]  ;;  %v435_v44 = vld [vmem:[%s2139_s1 + $0x3c8] sm:$0xff]  ;;  %v148_v45 = vld [vmem:[#allocation2 + $0x3d0] sm:$0xff] }
  0x6d   :  { %1007 = vst [vmem:[#allocation5 + $0x3a8] sm:$0xff] %v719_v34  ;;  %v722_v43 = vadd.f32 %v434_v41, %v146_v40  ;;  %v436_v46 = vld [vmem:[%s2139_s1 + $0x3d0] sm:$0xff]  ;;  %1008 = vst [vmem:[#allocation5 + $0x3b0] sm:$0xff] %v720_v38  ;;  %v723_v47 = vadd.f32 %v435_v44, %v147_v42  ;;  %v149_v49 = vld [vmem:[#allocation2 + $0x3d8] sm:$0xff] }
  0x6e   :  { %1009 = vst [vmem:[#allocation5 + $0x3b8] sm:$0xff] %v721_v39  ;;  %v724_v48 = vadd.f32 %v436_v46, %v148_v45  ;;  %v437_v50 = vld [vmem:[%s2139_s1 + $0x3d8] sm:$0xff]  ;;  %v150_v51 = vld [vmem:[#allocation2 + $0x3e0] sm:$0xff]  ;;  %v151_v54 = vld [vmem:[#allocation2 + $0x3e8] sm:$0xff] }
  0x6f   :  { %1010 = vst [vmem:[#allocation5 + $0x3c0] sm:$0xff] %v722_v43  ;;  %v725_v52 = vadd.f32 %v437_v50, %v149_v49  ;;  %v438_v53 = vld [vmem:[%s2139_s1 + $0x3e0] sm:$0xff]  ;;  %v439_v55 = vld [vmem:[%s2139_s1 + $0x3e8] sm:$0xff]  ;;  %1011 = vst [vmem:[#allocation5 + $0x3c8] sm:$0xff] %v723_v47 }
  0x70   :  { %1012 = vst [vmem:[#allocation5 + $0x3d0] sm:$0xff] %v724_v48  ;;  %v726_v56 = vadd.f32 %v438_v53, %v150_v51  ;;  %v727_v57 = vadd.f32 %v439_v55, %v151_v54  ;;  %v152_v58 = vld [vmem:[#allocation2 + $0x3f0] sm:$0xff]  ;;  %v153_v60 = vld [vmem:[#allocation2 + $0x3f8] sm:$0xff]  ;;  %v154_v63 = vld [vmem:[#allocation2 + $0x400] sm:$0xff] }
  0x71   :  { %v440_v59 = vld [vmem:[%s2139_s1 + $0x3f0] sm:$0xff]  ;;  %1013 = vst [vmem:[#allocation5 + $0x3d8] sm:$0xff] %v725_v52  ;;  %v441_v62 = vld [vmem:[%s2139_s1 + $0x3f8] sm:$0xff]  ;;  %v442_v0 = vld [vmem:[%s2139_s1 + $0x400] sm:$0xff] }
  0x72   :  { %v728_v61 = vadd.f32 %v440_v59, %v152_v58  ;;  %1014 = vst [vmem:[#allocation5 + $0x3e0] sm:$0xff] %v726_v56  ;;  %1015 = vst [vmem:[#allocation5 + $0x3e8] sm:$0xff] %v727_v57  ;;  %v729_v1 = vadd.f32 %v441_v62, %v153_v60  ;;  %v730_v2 = vadd.f32 %v442_v0, %v154_v63  ;;  %v155_v3 = vld [vmem:[#allocation2 + $0x408] sm:$0xff]  ;;  %v156_v5 = vld [vmem:[#allocation2 + $0x410] sm:$0xff] }
  0x73   :  { %v443_v4 = vld [vmem:[%s2139_s1 + $0x408] sm:$0xff]  ;;  %v444_v7 = vld [vmem:[%s2139_s1 + $0x410] sm:$0xff]  ;;  %v157_v8 = vld [vmem:[#allocation2 + $0x418] sm:$0xff] }
  0x74   :  { %1016 = vst [vmem:[#allocation5 + $0x3f0] sm:$0xff] %v728_v61  ;;  %v731_v6 = vadd.f32 %v443_v4, %v155_v3  ;;  %v445_v9 = vld [vmem:[%s2139_s1 + $0x418] sm:$0xff]  ;;  %1017 = vst [vmem:[#allocation5 + $0x3f8] sm:$0xff] %v729_v1  ;;  %v732_v10 = vadd.f32 %v444_v7, %v156_v5  ;;  %v158_v12 = vld [vmem:[#allocation2 + $0x420] sm:$0xff] }
  0x75   :  { %1018 = vst [vmem:[#allocation5 + $0x400] sm:$0xff] %v730_v2  ;;  %v733_v11 = vadd.f32 %v445_v9, %v157_v8  ;;  %v446_v13 = vld [vmem:[%s2139_s1 + $0x420] sm:$0xff]  ;;  %v159_v14 = vld [vmem:[#allocation2 + $0x428] sm:$0xff]  ;;  %v160_v17 = vld [vmem:[#allocation2 + $0x430] sm:$0xff] }
  0x76   :  { %1019 = vst [vmem:[#allocation5 + $0x408] sm:$0xff] %v731_v6  ;;  %v734_v15 = vadd.f32 %v446_v13, %v158_v12  ;;  %v447_v16 = vld [vmem:[%s2139_s1 + $0x428] sm:$0xff]  ;;  %v448_v18 = vld [vmem:[%s2139_s1 + $0x430] sm:$0xff]  ;;  %1020 = vst [vmem:[#allocation5 + $0x410] sm:$0xff] %v732_v10 }
  0x77   :  { %1021 = vst [vmem:[#allocation5 + $0x418] sm:$0xff] %v733_v11  ;;  %v735_v19 = vadd.f32 %v447_v16, %v159_v14  ;;  %v736_v20 = vadd.f32 %v448_v18, %v160_v17  ;;  %v161_v21 = vld [vmem:[#allocation2 + $0x438] sm:$0xff]  ;;  %v162_v23 = vld [vmem:[#allocation2 + $0x440] sm:$0xff]  ;;  %v163_v26 = vld [vmem:[#allocation2 + $0x448] sm:$0xff] }
  0x78   :  { %v449_v22 = vld [vmem:[%s2139_s1 + $0x438] sm:$0xff]  ;;  %1022 = vst [vmem:[#allocation5 + $0x420] sm:$0xff] %v734_v15  ;;  %v450_v25 = vld [vmem:[%s2139_s1 + $0x440] sm:$0xff]  ;;  %v451_v27 = vld [vmem:[%s2139_s1 + $0x448] sm:$0xff] }
  0x79   :  { %v737_v24 = vadd.f32 %v449_v22, %v161_v21  ;;  %1023 = vst [vmem:[#allocation5 + $0x428] sm:$0xff] %v735_v19  ;;  %1024 = vst [vmem:[#allocation5 + $0x430] sm:$0xff] %v736_v20  ;;  %v738_v28 = vadd.f32 %v450_v25, %v162_v23  ;;  %v739_v29 = vadd.f32 %v451_v27, %v163_v26  ;;  %v164_v30 = vld [vmem:[#allocation2 + $0x450] sm:$0xff]  ;;  %v165_v32 = vld [vmem:[#allocation2 + $0x458] sm:$0xff] }
  0x7a   :  { %v452_v31 = vld [vmem:[%s2139_s1 + $0x450] sm:$0xff]  ;;  %v453_v34 = vld [vmem:[%s2139_s1 + $0x458] sm:$0xff]  ;;  %v166_v35 = vld [vmem:[#allocation2 + $0x460] sm:$0xff] }
  0x7b   :  { %1025 = vst [vmem:[#allocation5 + $0x438] sm:$0xff] %v737_v24  ;;  %v740_v33 = vadd.f32 %v452_v31, %v164_v30  ;;  %v454_v36 = vld [vmem:[%s2139_s1 + $0x460] sm:$0xff]  ;;  %1026 = vst [vmem:[#allocation5 + $0x440] sm:$0xff] %v738_v28  ;;  %v741_v37 = vadd.f32 %v453_v34, %v165_v32  ;;  %v167_v39 = vld [vmem:[#allocation2 + $0x468] sm:$0xff] }
  0x7c   :  { %1027 = vst [vmem:[#allocation5 + $0x448] sm:$0xff] %v739_v29  ;;  %v742_v38 = vadd.f32 %v454_v36, %v166_v35  ;;  %v455_v40 = vld [vmem:[%s2139_s1 + $0x468] sm:$0xff]  ;;  %v168_v41 = vld [vmem:[#allocation2 + $0x470] sm:$0xff]  ;;  %v169_v44 = vld [vmem:[#allocation2 + $0x478] sm:$0xff] }
  0x7d   :  { %1028 = vst [vmem:[#allocation5 + $0x450] sm:$0xff] %v740_v33  ;;  %v743_v42 = vadd.f32 %v455_v40, %v167_v39  ;;  %v456_v43 = vld [vmem:[%s2139_s1 + $0x470] sm:$0xff]  ;;  %v457_v45 = vld [vmem:[%s2139_s1 + $0x478] sm:$0xff]  ;;  %1029 = vst [vmem:[#allocation5 + $0x458] sm:$0xff] %v741_v37 }
  0x7e   :  { %1030 = vst [vmem:[#allocation5 + $0x460] sm:$0xff] %v742_v38  ;;  %v744_v46 = vadd.f32 %v456_v43, %v168_v41  ;;  %v745_v47 = vadd.f32 %v457_v45, %v169_v44  ;;  %v170_v48 = vld [vmem:[#allocation2 + $0x480] sm:$0xff]  ;;  %v171_v50 = vld [vmem:[#allocation2 + $0x488] sm:$0xff]  ;;  %v172_v53 = vld [vmem:[#allocation2 + $0x490] sm:$0xff] }
  0x7f   :  { %v458_v49 = vld [vmem:[%s2139_s1 + $0x480] sm:$0xff]  ;;  %1031 = vst [vmem:[#allocation5 + $0x468] sm:$0xff] %v743_v42  ;;  %v459_v52 = vld [vmem:[%s2139_s1 + $0x488] sm:$0xff]  ;;  %v460_v54 = vld [vmem:[%s2139_s1 + $0x490] sm:$0xff] }
  0x80   :  { %v746_v51 = vadd.f32 %v458_v49, %v170_v48  ;;  %1032 = vst [vmem:[#allocation5 + $0x470] sm:$0xff] %v744_v46  ;;  %1033 = vst [vmem:[#allocation5 + $0x478] sm:$0xff] %v745_v47  ;;  %v747_v55 = vadd.f32 %v459_v52, %v171_v50  ;;  %v748_v56 = vadd.f32 %v460_v54, %v172_v53  ;;  %v173_v57 = vld [vmem:[#allocation2 + $0x498] sm:$0xff]  ;;  %v174_v59 = vld [vmem:[#allocation2 + $0x4a0] sm:$0xff] }
  0x81   :  { %v461_v58 = vld [vmem:[%s2139_s1 + $0x498] sm:$0xff]  ;;  %v462_v61 = vld [vmem:[%s2139_s1 + $0x4a0] sm:$0xff]  ;;  %v175_v62 = vld [vmem:[#allocation2 + $0x4a8] sm:$0xff] }
  0x82   :  { %1034 = vst [vmem:[#allocation5 + $0x480] sm:$0xff] %v746_v51  ;;  %v749_v60 = vadd.f32 %v461_v58, %v173_v57  ;;  %v463_v63 = vld [vmem:[%s2139_s1 + $0x4a8] sm:$0xff]  ;;  %1035 = vst [vmem:[#allocation5 + $0x488] sm:$0xff] %v747_v55  ;;  %v750_v0 = vadd.f32 %v462_v61, %v174_v59  ;;  %v176_v2 = vld [vmem:[#allocation2 + $0x4b0] sm:$0xff] }
  0x83   :  { %1036 = vst [vmem:[#allocation5 + $0x490] sm:$0xff] %v748_v56  ;;  %v751_v1 = vadd.f32 %v463_v63, %v175_v62  ;;  %v464_v3 = vld [vmem:[%s2139_s1 + $0x4b0] sm:$0xff]  ;;  %v177_v4 = vld [vmem:[#allocation2 + $0x4b8] sm:$0xff]  ;;  %v178_v7 = vld [vmem:[#allocation2 + $0x4c0] sm:$0xff] }
  0x84   :  { %1037 = vst [vmem:[#allocation5 + $0x498] sm:$0xff] %v749_v60  ;;  %v752_v5 = vadd.f32 %v464_v3, %v176_v2  ;;  %v465_v6 = vld [vmem:[%s2139_s1 + $0x4b8] sm:$0xff]  ;;  %v466_v8 = vld [vmem:[%s2139_s1 + $0x4c0] sm:$0xff]  ;;  %1038 = vst [vmem:[#allocation5 + $0x4a0] sm:$0xff] %v750_v0 }
  0x85   :  { %1039 = vst [vmem:[#allocation5 + $0x4a8] sm:$0xff] %v751_v1  ;;  %v753_v9 = vadd.f32 %v465_v6, %v177_v4  ;;  %v754_v10 = vadd.f32 %v466_v8, %v178_v7  ;;  %v179_v11 = vld [vmem:[#allocation2 + $0x4c8] sm:$0xff]  ;;  %v180_v13 = vld [vmem:[#allocation2 + $0x4d0] sm:$0xff]  ;;  %v181_v16 = vld [vmem:[#allocation2 + $0x4d8] sm:$0xff] }
  0x86   :  { %v467_v12 = vld [vmem:[%s2139_s1 + $0x4c8] sm:$0xff]  ;;  %1040 = vst [vmem:[#allocation5 + $0x4b0] sm:$0xff] %v752_v5  ;;  %v468_v15 = vld [vmem:[%s2139_s1 + $0x4d0] sm:$0xff]  ;;  %v469_v17 = vld [vmem:[%s2139_s1 + $0x4d8] sm:$0xff] }
  0x87   :  { %v755_v14 = vadd.f32 %v467_v12, %v179_v11  ;;  %1041 = vst [vmem:[#allocation5 + $0x4b8] sm:$0xff] %v753_v9  ;;  %1042 = vst [vmem:[#allocation5 + $0x4c0] sm:$0xff] %v754_v10  ;;  %v756_v18 = vadd.f32 %v468_v15, %v180_v13  ;;  %v757_v19 = vadd.f32 %v469_v17, %v181_v16  ;;  %v182_v20 = vld [vmem:[#allocation2 + $0x4e0] sm:$0xff]  ;;  %v183_v22 = vld [vmem:[#allocation2 + $0x4e8] sm:$0xff] }
  0x88   :  { %v470_v21 = vld [vmem:[%s2139_s1 + $0x4e0] sm:$0xff]  ;;  %v471_v24 = vld [vmem:[%s2139_s1 + $0x4e8] sm:$0xff]  ;;  %v184_v25 = vld [vmem:[#allocation2 + $0x4f0] sm:$0xff] }
  0x89   :  { %1043 = vst [vmem:[#allocation5 + $0x4c8] sm:$0xff] %v755_v14  ;;  %v758_v23 = vadd.f32 %v470_v21, %v182_v20  ;;  %v472_v26 = vld [vmem:[%s2139_s1 + $0x4f0] sm:$0xff]  ;;  %1044 = vst [vmem:[#allocation5 + $0x4d0] sm:$0xff] %v756_v18  ;;  %v759_v27 = vadd.f32 %v471_v24, %v183_v22  ;;  %v185_v29 = vld [vmem:[#allocation2 + $0x4f8] sm:$0xff] }
  0x8a   :  { %1045 = vst [vmem:[#allocation5 + $0x4d8] sm:$0xff] %v757_v19  ;;  %v760_v28 = vadd.f32 %v472_v26, %v184_v25  ;;  %v473_v30 = vld [vmem:[%s2139_s1 + $0x4f8] sm:$0xff]  ;;  %v186_v31 = vld [vmem:[#allocation2 + $0x500] sm:$0xff]  ;;  %v187_v34 = vld [vmem:[#allocation2 + $0x508] sm:$0xff] }
  0x8b   :  { %1046 = vst [vmem:[#allocation5 + $0x4e0] sm:$0xff] %v758_v23  ;;  %v761_v32 = vadd.f32 %v473_v30, %v185_v29  ;;  %v474_v33 = vld [vmem:[%s2139_s1 + $0x500] sm:$0xff]  ;;  %v475_v35 = vld [vmem:[%s2139_s1 + $0x508] sm:$0xff]  ;;  %1047 = vst [vmem:[#allocation5 + $0x4e8] sm:$0xff] %v759_v27 }
  0x8c   :  { %1048 = vst [vmem:[#allocation5 + $0x4f0] sm:$0xff] %v760_v28  ;;  %v762_v36 = vadd.f32 %v474_v33, %v186_v31  ;;  %v763_v37 = vadd.f32 %v475_v35, %v187_v34  ;;  %v188_v38 = vld [vmem:[#allocation2 + $0x510] sm:$0xff]  ;;  %v189_v40 = vld [vmem:[#allocation2 + $0x518] sm:$0xff]  ;;  %v190_v43 = vld [vmem:[#allocation2 + $0x520] sm:$0xff] }
  0x8d   :  { %v476_v39 = vld [vmem:[%s2139_s1 + $0x510] sm:$0xff]  ;;  %1049 = vst [vmem:[#allocation5 + $0x4f8] sm:$0xff] %v761_v32  ;;  %v477_v42 = vld [vmem:[%s2139_s1 + $0x518] sm:$0xff]  ;;  %v478_v44 = vld [vmem:[%s2139_s1 + $0x520] sm:$0xff] }
  0x8e   :  { %v764_v41 = vadd.f32 %v476_v39, %v188_v38  ;;  %1050 = vst [vmem:[#allocation5 + $0x500] sm:$0xff] %v762_v36  ;;  %1051 = vst [vmem:[#allocation5 + $0x508] sm:$0xff] %v763_v37  ;;  %v765_v45 = vadd.f32 %v477_v42, %v189_v40  ;;  %v766_v46 = vadd.f32 %v478_v44, %v190_v43  ;;  %v191_v47 = vld [vmem:[#allocation2 + $0x528] sm:$0xff]  ;;  %v192_v49 = vld [vmem:[#allocation2 + $0x530] sm:$0xff] }
  0x8f   :  { %v479_v48 = vld [vmem:[%s2139_s1 + $0x528] sm:$0xff]  ;;  %v480_v51 = vld [vmem:[%s2139_s1 + $0x530] sm:$0xff]  ;;  %v193_v52 = vld [vmem:[#allocation2 + $0x538] sm:$0xff] }
  0x90   :  { %1052 = vst [vmem:[#allocation5 + $0x510] sm:$0xff] %v764_v41  ;;  %v767_v50 = vadd.f32 %v479_v48, %v191_v47  ;;  %v481_v53 = vld [vmem:[%s2139_s1 + $0x538] sm:$0xff]  ;;  %1053 = vst [vmem:[#allocation5 + $0x518] sm:$0xff] %v765_v45  ;;  %v768_v54 = vadd.f32 %v480_v51, %v192_v49  ;;  %v194_v56 = vld [vmem:[#allocation2 + $0x540] sm:$0xff] }
  0x91   :  { %1054 = vst [vmem:[#allocation5 + $0x520] sm:$0xff] %v766_v46  ;;  %v769_v55 = vadd.f32 %v481_v53, %v193_v52  ;;  %v482_v57 = vld [vmem:[%s2139_s1 + $0x540] sm:$0xff]  ;;  %v195_v58 = vld [vmem:[#allocation2 + $0x548] sm:$0xff]  ;;  %v196_v61 = vld [vmem:[#allocation2 + $0x550] sm:$0xff] }
  0x92   :  { %1055 = vst [vmem:[#allocation5 + $0x528] sm:$0xff] %v767_v50  ;;  %v770_v59 = vadd.f32 %v482_v57, %v194_v56  ;;  %v483_v60 = vld [vmem:[%s2139_s1 + $0x548] sm:$0xff]  ;;  %v484_v62 = vld [vmem:[%s2139_s1 + $0x550] sm:$0xff]  ;;  %1056 = vst [vmem:[#allocation5 + $0x530] sm:$0xff] %v768_v54 }
  0x93   :  { %1057 = vst [vmem:[#allocation5 + $0x538] sm:$0xff] %v769_v55  ;;  %v771_v63 = vadd.f32 %v483_v60, %v195_v58  ;;  %v772_v0 = vadd.f32 %v484_v62, %v196_v61  ;;  %v197_v1 = vld [vmem:[#allocation2 + $0x558] sm:$0xff]  ;;  %v198_v3 = vld [vmem:[#allocation2 + $0x560] sm:$0xff]  ;;  %v199_v6 = vld [vmem:[#allocation2 + $0x568] sm:$0xff] }
  0x94   :  { %v485_v2 = vld [vmem:[%s2139_s1 + $0x558] sm:$0xff]  ;;  %1058 = vst [vmem:[#allocation5 + $0x540] sm:$0xff] %v770_v59  ;;  %v486_v5 = vld [vmem:[%s2139_s1 + $0x560] sm:$0xff]  ;;  %v487_v7 = vld [vmem:[%s2139_s1 + $0x568] sm:$0xff] }
  0x95   :  { %v773_v4 = vadd.f32 %v485_v2, %v197_v1  ;;  %1059 = vst [vmem:[#allocation5 + $0x548] sm:$0xff] %v771_v63  ;;  %1060 = vst [vmem:[#allocation5 + $0x550] sm:$0xff] %v772_v0  ;;  %v774_v8 = vadd.f32 %v486_v5, %v198_v3  ;;  %v775_v9 = vadd.f32 %v487_v7, %v199_v6  ;;  %v200_v10 = vld [vmem:[#allocation2 + $0x570] sm:$0xff]  ;;  %v201_v12 = vld [vmem:[#allocation2 + $0x578] sm:$0xff] }
  0x96   :  { %v488_v11 = vld [vmem:[%s2139_s1 + $0x570] sm:$0xff]  ;;  %v489_v14 = vld [vmem:[%s2139_s1 + $0x578] sm:$0xff]  ;;  %v202_v15 = vld [vmem:[#allocation2 + $0x580] sm:$0xff] }
  0x97   :  { %1061 = vst [vmem:[#allocation5 + $0x558] sm:$0xff] %v773_v4  ;;  %v776_v13 = vadd.f32 %v488_v11, %v200_v10  ;;  %v490_v16 = vld [vmem:[%s2139_s1 + $0x580] sm:$0xff]  ;;  %1062 = vst [vmem:[#allocation5 + $0x560] sm:$0xff] %v774_v8  ;;  %v777_v17 = vadd.f32 %v489_v14, %v201_v12  ;;  %v203_v19 = vld [vmem:[#allocation2 + $0x588] sm:$0xff] }
  0x98   :  { %1063 = vst [vmem:[#allocation5 + $0x568] sm:$0xff] %v775_v9  ;;  %v778_v18 = vadd.f32 %v490_v16, %v202_v15  ;;  %v491_v20 = vld [vmem:[%s2139_s1 + $0x588] sm:$0xff]  ;;  %v204_v21 = vld [vmem:[#allocation2 + $0x590] sm:$0xff]  ;;  %v205_v24 = vld [vmem:[#allocation2 + $0x598] sm:$0xff] }
  0x99   :  { %1064 = vst [vmem:[#allocation5 + $0x570] sm:$0xff] %v776_v13  ;;  %v779_v22 = vadd.f32 %v491_v20, %v203_v19  ;;  %v492_v23 = vld [vmem:[%s2139_s1 + $0x590] sm:$0xff]  ;;  %v493_v25 = vld [vmem:[%s2139_s1 + $0x598] sm:$0xff]  ;;  %1065 = vst [vmem:[#allocation5 + $0x578] sm:$0xff] %v777_v17 }
  0x9a   :  { %1066 = vst [vmem:[#allocation5 + $0x580] sm:$0xff] %v778_v18  ;;  %v780_v26 = vadd.f32 %v492_v23, %v204_v21  ;;  %v781_v27 = vadd.f32 %v493_v25, %v205_v24  ;;  %v206_v28 = vld [vmem:[#allocation2 + $0x5a0] sm:$0xff]  ;;  %v207_v30 = vld [vmem:[#allocation2 + $0x5a8] sm:$0xff]  ;;  %v208_v33 = vld [vmem:[#allocation2 + $0x5b0] sm:$0xff] }
  0x9b   :  { %v494_v29 = vld [vmem:[%s2139_s1 + $0x5a0] sm:$0xff]  ;;  %1067 = vst [vmem:[#allocation5 + $0x588] sm:$0xff] %v779_v22  ;;  %v495_v32 = vld [vmem:[%s2139_s1 + $0x5a8] sm:$0xff]  ;;  %v496_v34 = vld [vmem:[%s2139_s1 + $0x5b0] sm:$0xff] }
  0x9c   :  { %v782_v31 = vadd.f32 %v494_v29, %v206_v28  ;;  %1068 = vst [vmem:[#allocation5 + $0x590] sm:$0xff] %v780_v26  ;;  %1069 = vst [vmem:[#allocation5 + $0x598] sm:$0xff] %v781_v27  ;;  %v783_v35 = vadd.f32 %v495_v32, %v207_v30  ;;  %v784_v36 = vadd.f32 %v496_v34, %v208_v33  ;;  %v209_v37 = vld [vmem:[#allocation2 + $0x5b8] sm:$0xff]  ;;  %v210_v39 = vld [vmem:[#allocation2 + $0x5c0] sm:$0xff] }
  0x9d   :  { %v497_v38 = vld [vmem:[%s2139_s1 + $0x5b8] sm:$0xff]  ;;  %v498_v41 = vld [vmem:[%s2139_s1 + $0x5c0] sm:$0xff]  ;;  %v211_v42 = vld [vmem:[#allocation2 + $0x5c8] sm:$0xff] }
  0x9e   :  { %1070 = vst [vmem:[#allocation5 + $0x5a0] sm:$0xff] %v782_v31  ;;  %v785_v40 = vadd.f32 %v497_v38, %v209_v37  ;;  %v499_v43 = vld [vmem:[%s2139_s1 + $0x5c8] sm:$0xff]  ;;  %1071 = vst [vmem:[#allocation5 + $0x5a8] sm:$0xff] %v783_v35  ;;  %v786_v44 = vadd.f32 %v498_v41, %v210_v39  ;;  %v212_v46 = vld [vmem:[#allocation2 + $0x5d0] sm:$0xff] }
  0x9f   :  { %1072 = vst [vmem:[#allocation5 + $0x5b0] sm:$0xff] %v784_v36  ;;  %v787_v45 = vadd.f32 %v499_v43, %v211_v42  ;;  %v500_v47 = vld [vmem:[%s2139_s1 + $0x5d0] sm:$0xff]  ;;  %v213_v48 = vld [vmem:[#allocation2 + $0x5d8] sm:$0xff]  ;;  %v214_v51 = vld [vmem:[#allocation2 + $0x5e0] sm:$0xff] }
  0xa0   :  { %1073 = vst [vmem:[#allocation5 + $0x5b8] sm:$0xff] %v785_v40  ;;  %v788_v49 = vadd.f32 %v500_v47, %v212_v46  ;;  %v501_v50 = vld [vmem:[%s2139_s1 + $0x5d8] sm:$0xff]  ;;  %v502_v52 = vld [vmem:[%s2139_s1 + $0x5e0] sm:$0xff]  ;;  %1074 = vst [vmem:[#allocation5 + $0x5c0] sm:$0xff] %v786_v44 }
  0xa1   :  { %1075 = vst [vmem:[#allocation5 + $0x5c8] sm:$0xff] %v787_v45  ;;  %v789_v53 = vadd.f32 %v501_v50, %v213_v48  ;;  %v790_v54 = vadd.f32 %v502_v52, %v214_v51  ;;  %v215_v55 = vld [vmem:[#allocation2 + $0x5e8] sm:$0xff]  ;;  %v216_v57 = vld [vmem:[#allocation2 + $0x5f0] sm:$0xff]  ;;  %v217_v60 = vld [vmem:[#allocation2 + $0x5f8] sm:$0xff] }
  0xa2   :  { %v503_v56 = vld [vmem:[%s2139_s1 + $0x5e8] sm:$0xff]  ;;  %1076 = vst [vmem:[#allocation5 + $0x5d0] sm:$0xff] %v788_v49  ;;  %v504_v59 = vld [vmem:[%s2139_s1 + $0x5f0] sm:$0xff]  ;;  %v505_v61 = vld [vmem:[%s2139_s1 + $0x5f8] sm:$0xff] }
  0xa3   :  { %v791_v58 = vadd.f32 %v503_v56, %v215_v55  ;;  %1077 = vst [vmem:[#allocation5 + $0x5d8] sm:$0xff] %v789_v53  ;;  %1078 = vst [vmem:[#allocation5 + $0x5e0] sm:$0xff] %v790_v54  ;;  %v792_v62 = vadd.f32 %v504_v59, %v216_v57  ;;  %v793_v63 = vadd.f32 %v505_v61, %v217_v60  ;;  %v218_v0 = vld [vmem:[#allocation2 + $0x600] sm:$0xff]  ;;  %v219_v2 = vld [vmem:[#allocation2 + $0x608] sm:$0xff] }
  0xa4   :  { %v506_v1 = vld [vmem:[%s2139_s1 + $0x600] sm:$0xff]  ;;  %v507_v4 = vld [vmem:[%s2139_s1 + $0x608] sm:$0xff]  ;;  %v220_v5 = vld [vmem:[#allocation2 + $0x610] sm:$0xff] }
  0xa5   :  { %1079 = vst [vmem:[#allocation5 + $0x5e8] sm:$0xff] %v791_v58  ;;  %v794_v3 = vadd.f32 %v506_v1, %v218_v0  ;;  %v508_v6 = vld [vmem:[%s2139_s1 + $0x610] sm:$0xff]  ;;  %1080 = vst [vmem:[#allocation5 + $0x5f0] sm:$0xff] %v792_v62  ;;  %v795_v7 = vadd.f32 %v507_v4, %v219_v2  ;;  %v221_v9 = vld [vmem:[#allocation2 + $0x618] sm:$0xff] }
  0xa6   :  { %1081 = vst [vmem:[#allocation5 + $0x5f8] sm:$0xff] %v793_v63  ;;  %v796_v8 = vadd.f32 %v508_v6, %v220_v5  ;;  %v509_v10 = vld [vmem:[%s2139_s1 + $0x618] sm:$0xff]  ;;  %v222_v11 = vld [vmem:[#allocation2 + $0x620] sm:$0xff]  ;;  %v223_v14 = vld [vmem:[#allocation2 + $0x628] sm:$0xff] }
  0xa7   :  { %1082 = vst [vmem:[#allocation5 + $0x600] sm:$0xff] %v794_v3  ;;  %v797_v12 = vadd.f32 %v509_v10, %v221_v9  ;;  %v510_v13 = vld [vmem:[%s2139_s1 + $0x620] sm:$0xff]  ;;  %v511_v15 = vld [vmem:[%s2139_s1 + $0x628] sm:$0xff]  ;;  %1083 = vst [vmem:[#allocation5 + $0x608] sm:$0xff] %v795_v7 }
  0xa8   :  { %1084 = vst [vmem:[#allocation5 + $0x610] sm:$0xff] %v796_v8  ;;  %v798_v16 = vadd.f32 %v510_v13, %v222_v11  ;;  %v799_v17 = vadd.f32 %v511_v15, %v223_v14  ;;  %v224_v18 = vld [vmem:[#allocation2 + $0x630] sm:$0xff]  ;;  %v225_v20 = vld [vmem:[#allocation2 + $0x638] sm:$0xff]  ;;  %v226_v23 = vld [vmem:[#allocation2 + $0x640] sm:$0xff] }
  0xa9   :  { %v512_v19 = vld [vmem:[%s2139_s1 + $0x630] sm:$0xff]  ;;  %1085 = vst [vmem:[#allocation5 + $0x618] sm:$0xff] %v797_v12  ;;  %v513_v22 = vld [vmem:[%s2139_s1 + $0x638] sm:$0xff]  ;;  %v514_v24 = vld [vmem:[%s2139_s1 + $0x640] sm:$0xff] }
  0xaa   :  { %v800_v21 = vadd.f32 %v512_v19, %v224_v18  ;;  %1086 = vst [vmem:[#allocation5 + $0x620] sm:$0xff] %v798_v16  ;;  %1087 = vst [vmem:[#allocation5 + $0x628] sm:$0xff] %v799_v17  ;;  %v801_v25 = vadd.f32 %v513_v22, %v225_v20  ;;  %v802_v26 = vadd.f32 %v514_v24, %v226_v23  ;;  %v227_v27 = vld [vmem:[#allocation2 + $0x648] sm:$0xff]  ;;  %v228_v29 = vld [vmem:[#allocation2 + $0x650] sm:$0xff] }
  0xab   :  { %v515_v28 = vld [vmem:[%s2139_s1 + $0x648] sm:$0xff]  ;;  %v516_v31 = vld [vmem:[%s2139_s1 + $0x650] sm:$0xff]  ;;  %v229_v32 = vld [vmem:[#allocation2 + $0x658] sm:$0xff] }
  0xac   :  { %1088 = vst [vmem:[#allocation5 + $0x630] sm:$0xff] %v800_v21  ;;  %v803_v30 = vadd.f32 %v515_v28, %v227_v27  ;;  %v517_v33 = vld [vmem:[%s2139_s1 + $0x658] sm:$0xff]  ;;  %1089 = vst [vmem:[#allocation5 + $0x638] sm:$0xff] %v801_v25  ;;  %v804_v34 = vadd.f32 %v516_v31, %v228_v29  ;;  %v230_v36 = vld [vmem:[#allocation2 + $0x660] sm:$0xff] }
  0xad   :  { %1090 = vst [vmem:[#allocation5 + $0x640] sm:$0xff] %v802_v26  ;;  %v805_v35 = vadd.f32 %v517_v33, %v229_v32  ;;  %v518_v37 = vld [vmem:[%s2139_s1 + $0x660] sm:$0xff]  ;;  %v231_v38 = vld [vmem:[#allocation2 + $0x668] sm:$0xff]  ;;  %v232_v41 = vld [vmem:[#allocation2 + $0x670] sm:$0xff] }
  0xae   :  { %1091 = vst [vmem:[#allocation5 + $0x648] sm:$0xff] %v803_v30  ;;  %v806_v39 = vadd.f32 %v518_v37, %v230_v36  ;;  %v519_v40 = vld [vmem:[%s2139_s1 + $0x668] sm:$0xff]  ;;  %v520_v42 = vld [vmem:[%s2139_s1 + $0x670] sm:$0xff]  ;;  %1092 = vst [vmem:[#allocation5 + $0x650] sm:$0xff] %v804_v34 }
  0xaf   :  { %1093 = vst [vmem:[#allocation5 + $0x658] sm:$0xff] %v805_v35  ;;  %v807_v43 = vadd.f32 %v519_v40, %v231_v38  ;;  %v808_v44 = vadd.f32 %v520_v42, %v232_v41  ;;  %v233_v45 = vld [vmem:[#allocation2 + $0x678] sm:$0xff]  ;;  %v234_v47 = vld [vmem:[#allocation2 + $0x680] sm:$0xff]  ;;  %v235_v50 = vld [vmem:[#allocation2 + $0x688] sm:$0xff] }
  0xb0   :  { %v521_v46 = vld [vmem:[%s2139_s1 + $0x678] sm:$0xff]  ;;  %1094 = vst [vmem:[#allocation5 + $0x660] sm:$0xff] %v806_v39  ;;  %v522_v49 = vld [vmem:[%s2139_s1 + $0x680] sm:$0xff]  ;;  %v523_v51 = vld [vmem:[%s2139_s1 + $0x688] sm:$0xff] }
  0xb1   :  { %v809_v48 = vadd.f32 %v521_v46, %v233_v45  ;;  %1095 = vst [vmem:[#allocation5 + $0x668] sm:$0xff] %v807_v43  ;;  %1096 = vst [vmem:[#allocation5 + $0x670] sm:$0xff] %v808_v44  ;;  %v810_v52 = vadd.f32 %v522_v49, %v234_v47  ;;  %v811_v53 = vadd.f32 %v523_v51, %v235_v50  ;;  %v236_v54 = vld [vmem:[#allocation2 + $0x690] sm:$0xff]  ;;  %v237_v56 = vld [vmem:[#allocation2 + $0x698] sm:$0xff] }
  0xb2   :  { %v524_v55 = vld [vmem:[%s2139_s1 + $0x690] sm:$0xff]  ;;  %v525_v58 = vld [vmem:[%s2139_s1 + $0x698] sm:$0xff]  ;;  %v238_v59 = vld [vmem:[#allocation2 + $0x6a0] sm:$0xff] }
  0xb3   :  { %1097 = vst [vmem:[#allocation5 + $0x678] sm:$0xff] %v809_v48  ;;  %v812_v57 = vadd.f32 %v524_v55, %v236_v54  ;;  %v526_v60 = vld [vmem:[%s2139_s1 + $0x6a0] sm:$0xff]  ;;  %1098 = vst [vmem:[#allocation5 + $0x680] sm:$0xff] %v810_v52  ;;  %v813_v61 = vadd.f32 %v525_v58, %v237_v56  ;;  %v239_v63 = vld [vmem:[#allocation2 + $0x6a8] sm:$0xff] }
  0xb4   :  { %1099 = vst [vmem:[#allocation5 + $0x688] sm:$0xff] %v811_v53  ;;  %v814_v62 = vadd.f32 %v526_v60, %v238_v59  ;;  %v527_v0 = vld [vmem:[%s2139_s1 + $0x6a8] sm:$0xff]  ;;  %v240_v1 = vld [vmem:[#allocation2 + $0x6b0] sm:$0xff]  ;;  %v241_v4 = vld [vmem:[#allocation2 + $0x6b8] sm:$0xff] }
  0xb5   :  { %1100 = vst [vmem:[#allocation5 + $0x690] sm:$0xff] %v812_v57  ;;  %v815_v2 = vadd.f32 %v527_v0, %v239_v63  ;;  %v528_v3 = vld [vmem:[%s2139_s1 + $0x6b0] sm:$0xff]  ;;  %v529_v5 = vld [vmem:[%s2139_s1 + $0x6b8] sm:$0xff]  ;;  %1101 = vst [vmem:[#allocation5 + $0x698] sm:$0xff] %v813_v61 }
  0xb6   :  { %1102 = vst [vmem:[#allocation5 + $0x6a0] sm:$0xff] %v814_v62  ;;  %v816_v6 = vadd.f32 %v528_v3, %v240_v1  ;;  %v817_v7 = vadd.f32 %v529_v5, %v241_v4  ;;  %v242_v8 = vld [vmem:[#allocation2 + $0x6c0] sm:$0xff]  ;;  %v243_v10 = vld [vmem:[#allocation2 + $0x6c8] sm:$0xff]  ;;  %v244_v13 = vld [vmem:[#allocation2 + $0x6d0] sm:$0xff] }
  0xb7   :  { %v530_v9 = vld [vmem:[%s2139_s1 + $0x6c0] sm:$0xff]  ;;  %1103 = vst [vmem:[#allocation5 + $0x6a8] sm:$0xff] %v815_v2  ;;  %v531_v12 = vld [vmem:[%s2139_s1 + $0x6c8] sm:$0xff]  ;;  %v532_v14 = vld [vmem:[%s2139_s1 + $0x6d0] sm:$0xff] }
  0xb8   :  { %v818_v11 = vadd.f32 %v530_v9, %v242_v8  ;;  %1104 = vst [vmem:[#allocation5 + $0x6b0] sm:$0xff] %v816_v6  ;;  %1105 = vst [vmem:[#allocation5 + $0x6b8] sm:$0xff] %v817_v7  ;;  %v819_v15 = vadd.f32 %v531_v12, %v243_v10  ;;  %v820_v16 = vadd.f32 %v532_v14, %v244_v13  ;;  %v245_v17 = vld [vmem:[#allocation2 + $0x6d8] sm:$0xff]  ;;  %v246_v19 = vld [vmem:[#allocation2 + $0x6e0] sm:$0xff] }
  0xb9   :  { %v533_v18 = vld [vmem:[%s2139_s1 + $0x6d8] sm:$0xff]  ;;  %v534_v21 = vld [vmem:[%s2139_s1 + $0x6e0] sm:$0xff]  ;;  %v247_v22 = vld [vmem:[#allocation2 + $0x6e8] sm:$0xff] }
  0xba   :  { %1106 = vst [vmem:[#allocation5 + $0x6c0] sm:$0xff] %v818_v11  ;;  %v821_v20 = vadd.f32 %v533_v18, %v245_v17  ;;  %v535_v23 = vld [vmem:[%s2139_s1 + $0x6e8] sm:$0xff]  ;;  %1107 = vst [vmem:[#allocation5 + $0x6c8] sm:$0xff] %v819_v15  ;;  %v822_v24 = vadd.f32 %v534_v21, %v246_v19  ;;  %v248_v26 = vld [vmem:[#allocation2 + $0x6f0] sm:$0xff] }
  0xbb   :  { %1108 = vst [vmem:[#allocation5 + $0x6d0] sm:$0xff] %v820_v16  ;;  %v823_v25 = vadd.f32 %v535_v23, %v247_v22  ;;  %v536_v27 = vld [vmem:[%s2139_s1 + $0x6f0] sm:$0xff]  ;;  %v249_v28 = vld [vmem:[#allocation2 + $0x6f8] sm:$0xff]  ;;  %v250_v31 = vld [vmem:[#allocation2 + $0x700] sm:$0xff] }
  0xbc   :  { %1109 = vst [vmem:[#allocation5 + $0x6d8] sm:$0xff] %v821_v20  ;;  %v824_v29 = vadd.f32 %v536_v27, %v248_v26  ;;  %v537_v30 = vld [vmem:[%s2139_s1 + $0x6f8] sm:$0xff]  ;;  %v538_v32 = vld [vmem:[%s2139_s1 + $0x700] sm:$0xff]  ;;  %1110 = vst [vmem:[#allocation5 + $0x6e0] sm:$0xff] %v822_v24 }
  0xbd   :  { %1111 = vst [vmem:[#allocation5 + $0x6e8] sm:$0xff] %v823_v25  ;;  %v825_v33 = vadd.f32 %v537_v30, %v249_v28  ;;  %v826_v34 = vadd.f32 %v538_v32, %v250_v31  ;;  %v251_v35 = vld [vmem:[#allocation2 + $0x708] sm:$0xff]  ;;  %v252_v37 = vld [vmem:[#allocation2 + $0x710] sm:$0xff]  ;;  %v253_v40 = vld [vmem:[#allocation2 + $0x718] sm:$0xff] }
  0xbe   :  { %v539_v36 = vld [vmem:[%s2139_s1 + $0x708] sm:$0xff]  ;;  %1112 = vst [vmem:[#allocation5 + $0x6f0] sm:$0xff] %v824_v29  ;;  %v540_v39 = vld [vmem:[%s2139_s1 + $0x710] sm:$0xff]  ;;  %v541_v41 = vld [vmem:[%s2139_s1 + $0x718] sm:$0xff] }
  0xbf   :  { %v827_v38 = vadd.f32 %v539_v36, %v251_v35  ;;  %1113 = vst [vmem:[#allocation5 + $0x6f8] sm:$0xff] %v825_v33  ;;  %1114 = vst [vmem:[#allocation5 + $0x700] sm:$0xff] %v826_v34  ;;  %v828_v42 = vadd.f32 %v540_v39, %v252_v37  ;;  %v829_v43 = vadd.f32 %v541_v41, %v253_v40  ;;  %v254_v44 = vld [vmem:[#allocation2 + $0x720] sm:$0xff]  ;;  %v255_v46 = vld [vmem:[#allocation2 + $0x728] sm:$0xff] }
  0xc0   :  { %v542_v45 = vld [vmem:[%s2139_s1 + $0x720] sm:$0xff]  ;;  %v543_v48 = vld [vmem:[%s2139_s1 + $0x728] sm:$0xff]  ;;  %v256_v49 = vld [vmem:[#allocation2 + $0x730] sm:$0xff] }
  0xc1   :  { %1115 = vst [vmem:[#allocation5 + $0x708] sm:$0xff] %v827_v38  ;;  %v830_v47 = vadd.f32 %v542_v45, %v254_v44  ;;  %v544_v50 = vld [vmem:[%s2139_s1 + $0x730] sm:$0xff]  ;;  %1116 = vst [vmem:[#allocation5 + $0x710] sm:$0xff] %v828_v42  ;;  %v831_v51 = vadd.f32 %v543_v48, %v255_v46  ;;  %v257_v53 = vld [vmem:[#allocation2 + $0x738] sm:$0xff] }
  0xc2   :  { %1117 = vst [vmem:[#allocation5 + $0x718] sm:$0xff] %v829_v43  ;;  %v832_v52 = vadd.f32 %v544_v50, %v256_v49  ;;  %v545_v54 = vld [vmem:[%s2139_s1 + $0x738] sm:$0xff]  ;;  %v258_v55 = vld [vmem:[#allocation2 + $0x740] sm:$0xff]  ;;  %v259_v58 = vld [vmem:[#allocation2 + $0x748] sm:$0xff] }
  0xc3   :  { %1118 = vst [vmem:[#allocation5 + $0x720] sm:$0xff] %v830_v47  ;;  %v833_v56 = vadd.f32 %v545_v54, %v257_v53  ;;  %v546_v57 = vld [vmem:[%s2139_s1 + $0x740] sm:$0xff]  ;;  %v547_v59 = vld [vmem:[%s2139_s1 + $0x748] sm:$0xff]  ;;  %1119 = vst [vmem:[#allocation5 + $0x728] sm:$0xff] %v831_v51 }
  0xc4   :  { %1120 = vst [vmem:[#allocation5 + $0x730] sm:$0xff] %v832_v52  ;;  %v834_v60 = vadd.f32 %v546_v57, %v258_v55  ;;  %v835_v61 = vadd.f32 %v547_v59, %v259_v58  ;;  %v260_v62 = vld [vmem:[#allocation2 + $0x750] sm:$0xff]  ;;  %v261_v0 = vld [vmem:[#allocation2 + $0x758] sm:$0xff]  ;;  %v262_v3 = vld [vmem:[#allocation2 + $0x760] sm:$0xff] }
  0xc5   :  { %v548_v63 = vld [vmem:[%s2139_s1 + $0x750] sm:$0xff]  ;;  %1121 = vst [vmem:[#allocation5 + $0x738] sm:$0xff] %v833_v56  ;;  %v549_v2 = vld [vmem:[%s2139_s1 + $0x758] sm:$0xff]  ;;  %v550_v4 = vld [vmem:[%s2139_s1 + $0x760] sm:$0xff] }
  0xc6   :  { %v836_v1 = vadd.f32 %v548_v63, %v260_v62  ;;  %1122 = vst [vmem:[#allocation5 + $0x740] sm:$0xff] %v834_v60  ;;  %1123 = vst [vmem:[#allocation5 + $0x748] sm:$0xff] %v835_v61  ;;  %v837_v5 = vadd.f32 %v549_v2, %v261_v0  ;;  %v838_v6 = vadd.f32 %v550_v4, %v262_v3  ;;  %v263_v7 = vld [vmem:[#allocation2 + $0x768] sm:$0xff]  ;;  %v264_v9 = vld [vmem:[#allocation2 + $0x770] sm:$0xff] }
  0xc7   :  { %v551_v8 = vld [vmem:[%s2139_s1 + $0x768] sm:$0xff]  ;;  %v552_v11 = vld [vmem:[%s2139_s1 + $0x770] sm:$0xff]  ;;  %v265_v12 = vld [vmem:[#allocation2 + $0x778] sm:$0xff] }
  0xc8   :  { %1124 = vst [vmem:[#allocation5 + $0x750] sm:$0xff] %v836_v1  ;;  %v839_v10 = vadd.f32 %v551_v8, %v263_v7  ;;  %v553_v13 = vld [vmem:[%s2139_s1 + $0x778] sm:$0xff]  ;;  %1125 = vst [vmem:[#allocation5 + $0x758] sm:$0xff] %v837_v5  ;;  %v840_v14 = vadd.f32 %v552_v11, %v264_v9  ;;  %v266_v16 = vld [vmem:[#allocation2 + $0x780] sm:$0xff] }
  0xc9   :  { %1126 = vst [vmem:[#allocation5 + $0x760] sm:$0xff] %v838_v6  ;;  %v841_v15 = vadd.f32 %v553_v13, %v265_v12  ;;  %v554_v17 = vld [vmem:[%s2139_s1 + $0x780] sm:$0xff]  ;;  %v267_v18 = vld [vmem:[#allocation2 + $0x788] sm:$0xff]  ;;  %v268_v21 = vld [vmem:[#allocation2 + $0x790] sm:$0xff] }
  0xca   :  { %1127 = vst [vmem:[#allocation5 + $0x768] sm:$0xff] %v839_v10  ;;  %v842_v19 = vadd.f32 %v554_v17, %v266_v16  ;;  %v555_v20 = vld [vmem:[%s2139_s1 + $0x788] sm:$0xff]  ;;  %v556_v22 = vld [vmem:[%s2139_s1 + $0x790] sm:$0xff]  ;;  %1128 = vst [vmem:[#allocation5 + $0x770] sm:$0xff] %v840_v14 }
  0xcb   :  { %1129 = vst [vmem:[#allocation5 + $0x778] sm:$0xff] %v841_v15  ;;  %v843_v23 = vadd.f32 %v555_v20, %v267_v18  ;;  %v844_v24 = vadd.f32 %v556_v22, %v268_v21  ;;  %v269_v25 = vld [vmem:[#allocation2 + $0x798] sm:$0xff]  ;;  %v270_v27 = vld [vmem:[#allocation2 + $0x7a0] sm:$0xff]  ;;  %v271_v30 = vld [vmem:[#allocation2 + $0x7a8] sm:$0xff] }
  0xcc   :  { %v557_v26 = vld [vmem:[%s2139_s1 + $0x798] sm:$0xff]  ;;  %1130 = vst [vmem:[#allocation5 + $0x780] sm:$0xff] %v842_v19  ;;  %v558_v29 = vld [vmem:[%s2139_s1 + $0x7a0] sm:$0xff]  ;;  %v559_v31 = vld [vmem:[%s2139_s1 + $0x7a8] sm:$0xff] }
  0xcd   :  { %v845_v28 = vadd.f32 %v557_v26, %v269_v25  ;;  %1131 = vst [vmem:[#allocation5 + $0x788] sm:$0xff] %v843_v23  ;;  %1132 = vst [vmem:[#allocation5 + $0x790] sm:$0xff] %v844_v24  ;;  %v846_v32 = vadd.f32 %v558_v29, %v270_v27  ;;  %v847_v33 = vadd.f32 %v559_v31, %v271_v30  ;;  %v272_v34 = vld [vmem:[#allocation2 + $0x7b0] sm:$0xff]  ;;  %v273_v36 = vld [vmem:[#allocation2 + $0x7b8] sm:$0xff] }
  0xce   :  { %v560_v35 = vld [vmem:[%s2139_s1 + $0x7b0] sm:$0xff]  ;;  %v561_v38 = vld [vmem:[%s2139_s1 + $0x7b8] sm:$0xff]  ;;  %v274_v39 = vld [vmem:[#allocation2 + $0x7c0] sm:$0xff] }
  0xcf   :  { %1133 = vst [vmem:[#allocation5 + $0x798] sm:$0xff] %v845_v28  ;;  %v848_v37 = vadd.f32 %v560_v35, %v272_v34  ;;  %v562_v40 = vld [vmem:[%s2139_s1 + $0x7c0] sm:$0xff]  ;;  %1134 = vst [vmem:[#allocation5 + $0x7a0] sm:$0xff] %v846_v32  ;;  %v849_v41 = vadd.f32 %v561_v38, %v273_v36  ;;  %v275_v43 = vld [vmem:[#allocation2 + $0x7c8] sm:$0xff] }
  0xd0   :  { %1135 = vst [vmem:[#allocation5 + $0x7a8] sm:$0xff] %v847_v33  ;;  %v850_v42 = vadd.f32 %v562_v40, %v274_v39  ;;  %v563_v44 = vld [vmem:[%s2139_s1 + $0x7c8] sm:$0xff]  ;;  %v276_v45 = vld [vmem:[#allocation2 + $0x7d0] sm:$0xff]  ;;  %v277_v48 = vld [vmem:[#allocation2 + $0x7d8] sm:$0xff] }
  0xd1   :  { %1136 = vst [vmem:[#allocation5 + $0x7b0] sm:$0xff] %v848_v37  ;;  %v851_v46 = vadd.f32 %v563_v44, %v275_v43  ;;  %v564_v47 = vld [vmem:[%s2139_s1 + $0x7d0] sm:$0xff]  ;;  %v565_v49 = vld [vmem:[%s2139_s1 + $0x7d8] sm:$0xff]  ;;  %1137 = vst [vmem:[#allocation5 + $0x7b8] sm:$0xff] %v849_v41 }
  0xd2   :  { %1138 = vst [vmem:[#allocation5 + $0x7c0] sm:$0xff] %v850_v42  ;;  %v852_v50 = vadd.f32 %v564_v47, %v276_v45  ;;  %v853_v51 = vadd.f32 %v565_v49, %v277_v48  ;;  %v278_v52 = vld [vmem:[#allocation2 + $0x7e0] sm:$0xff]  ;;  %v279_v54 = vld [vmem:[#allocation2 + $0x7e8] sm:$0xff]  ;;  %v280_v57 = vld [vmem:[#allocation2 + $0x7f0] sm:$0xff] }
  0xd3   :  { %v566_v53 = vld [vmem:[%s2139_s1 + $0x7e0] sm:$0xff]  ;;  %1139 = vst [vmem:[#allocation5 + $0x7c8] sm:$0xff] %v851_v46  ;;  %v567_v56 = vld [vmem:[%s2139_s1 + $0x7e8] sm:$0xff]  ;;  %v568_v58 = vld [vmem:[%s2139_s1 + $0x7f0] sm:$0xff] }
  0xd4   :  { %v854_v55 = vadd.f32 %v566_v53, %v278_v52  ;;  %1140 = vst [vmem:[#allocation5 + $0x7d0] sm:$0xff] %v852_v50  ;;  %1141 = vst [vmem:[#allocation5 + $0x7d8] sm:$0xff] %v853_v51  ;;  %v855_v59 = vadd.f32 %v567_v56, %v279_v54  ;;  %v856_v60 = vadd.f32 %v568_v58, %v280_v57  ;;  %v281_v61 = vld [vmem:[#allocation2 + $0x7f8] sm:$0xff]  ;;  %v282_v63 = vld [vmem:[#allocation2 + $0x800] sm:$0xff] }
  0xd5   :  { %v569_v62 = vld [vmem:[%s2139_s1 + $0x7f8] sm:$0xff]  ;;  %v570_v1 = vld [vmem:[%s2139_s1 + $0x800] sm:$0xff]  ;;  %v283_v2 = vld [vmem:[#allocation2 + $0x808] sm:$0xff] }
  0xd6   :  { %1142 = vst [vmem:[#allocation5 + $0x7e0] sm:$0xff] %v854_v55  ;;  %v857_v0 = vadd.f32 %v569_v62, %v281_v61  ;;  %v571_v3 = vld [vmem:[%s2139_s1 + $0x808] sm:$0xff]  ;;  %1143 = vst [vmem:[#allocation5 + $0x7e8] sm:$0xff] %v855_v59  ;;  %v858_v4 = vadd.f32 %v570_v1, %v282_v63  ;;  %v284_v6 = vld [vmem:[#allocation2 + $0x810] sm:$0xff] }
  0xd7   :  { %1144 = vst [vmem:[#allocation5 + $0x7f0] sm:$0xff] %v856_v60  ;;  %v859_v5 = vadd.f32 %v571_v3, %v283_v2  ;;  %v572_v7 = vld [vmem:[%s2139_s1 + $0x810] sm:$0xff]  ;;  %v285_v8 = vld [vmem:[#allocation2 + $0x818] sm:$0xff]  ;;  %v286_v11 = vld [vmem:[#allocation2 + $0x820] sm:$0xff] }
  0xd8   :  { %1145 = vst [vmem:[#allocation5 + $0x7f8] sm:$0xff] %v857_v0  ;;  %v860_v9 = vadd.f32 %v572_v7, %v284_v6  ;;  %v573_v10 = vld [vmem:[%s2139_s1 + $0x818] sm:$0xff]  ;;  %v574_v12 = vld [vmem:[%s2139_s1 + $0x820] sm:$0xff]  ;;  %1146 = vst [vmem:[#allocation5 + $0x800] sm:$0xff] %v858_v4 }
  0xd9   :  { %1147 = vst [vmem:[#allocation5 + $0x808] sm:$0xff] %v859_v5  ;;  %v861_v13 = vadd.f32 %v573_v10, %v285_v8  ;;  %v862_v14 = vadd.f32 %v574_v12, %v286_v11  ;;  %v287_v15 = vld [vmem:[#allocation2 + $0x828] sm:$0xff]  ;;  %v288_v17 = vld [vmem:[#allocation2 + $0x830] sm:$0xff]  ;;  %v289_v20 = vld [vmem:[#allocation2 + $0x838] sm:$0xff] }
  0xda   :  { %v575_v16 = vld [vmem:[%s2139_s1 + $0x828] sm:$0xff]  ;;  %1148 = vst [vmem:[#allocation5 + $0x810] sm:$0xff] %v860_v9  ;;  %v576_v19 = vld [vmem:[%s2139_s1 + $0x830] sm:$0xff]  ;;  %v577_v21 = vld [vmem:[%s2139_s1 + $0x838] sm:$0xff] }
  0xdb   :  { %v863_v18 = vadd.f32 %v575_v16, %v287_v15  ;;  %1149 = vst [vmem:[#allocation5 + $0x818] sm:$0xff] %v861_v13  ;;  %1150 = vst [vmem:[#allocation5 + $0x820] sm:$0xff] %v862_v14  ;;  %v864_v22 = vadd.f32 %v576_v19, %v288_v17  ;;  %v865_v23 = vadd.f32 %v577_v21, %v289_v20  ;;  %v290_v24 = vld [vmem:[#allocation2 + $0x840] sm:$0xff]  ;;  %v291_v26 = vld [vmem:[#allocation2 + $0x848] sm:$0xff] }
  0xdc   :  { %v578_v25 = vld [vmem:[%s2139_s1 + $0x840] sm:$0xff]  ;;  %v579_v28 = vld [vmem:[%s2139_s1 + $0x848] sm:$0xff]  ;;  %v292_v29 = vld [vmem:[#allocation2 + $0x850] sm:$0xff] }
  0xdd   :  { %1151 = vst [vmem:[#allocation5 + $0x828] sm:$0xff] %v863_v18  ;;  %v866_v27 = vadd.f32 %v578_v25, %v290_v24  ;;  %v580_v30 = vld [vmem:[%s2139_s1 + $0x850] sm:$0xff]  ;;  %1152 = vst [vmem:[#allocation5 + $0x830] sm:$0xff] %v864_v22  ;;  %v867_v31 = vadd.f32 %v579_v28, %v291_v26  ;;  %v293_v33 = vld [vmem:[#allocation2 + $0x858] sm:$0xff] }
  0xde   :  { %1153 = vst [vmem:[#allocation5 + $0x838] sm:$0xff] %v865_v23  ;;  %v868_v32 = vadd.f32 %v580_v30, %v292_v29  ;;  %v581_v34 = vld [vmem:[%s2139_s1 + $0x858] sm:$0xff]  ;;  %v294_v35 = vld [vmem:[#allocation2 + $0x860] sm:$0xff]  ;;  %v295_v38 = vld [vmem:[#allocation2 + $0x868] sm:$0xff] }
  0xdf   :  { %1154 = vst [vmem:[#allocation5 + $0x840] sm:$0xff] %v866_v27  ;;  %v869_v36 = vadd.f32 %v581_v34, %v293_v33  ;;  %v582_v37 = vld [vmem:[%s2139_s1 + $0x860] sm:$0xff]  ;;  %v583_v39 = vld [vmem:[%s2139_s1 + $0x868] sm:$0xff]  ;;  %1155 = vst [vmem:[#allocation5 + $0x848] sm:$0xff] %v867_v31 }
  0xe0   :  { %1156 = vst [vmem:[#allocation5 + $0x850] sm:$0xff] %v868_v32  ;;  %v870_v40 = vadd.f32 %v582_v37, %v294_v35  ;;  %v871_v41 = vadd.f32 %v583_v39, %v295_v38  ;;  %v296_v42 = vld [vmem:[#allocation2 + $0x870] sm:$0xff]  ;;  %v297_v44 = vld [vmem:[#allocation2 + $0x878] sm:$0xff]  ;;  %v298_v47 = vld [vmem:[#allocation2 + $0x880] sm:$0xff] }
  0xe1   :  { %v584_v43 = vld [vmem:[%s2139_s1 + $0x870] sm:$0xff]  ;;  %1157 = vst [vmem:[#allocation5 + $0x858] sm:$0xff] %v869_v36  ;;  %v585_v46 = vld [vmem:[%s2139_s1 + $0x878] sm:$0xff]  ;;  %v586_v48 = vld [vmem:[%s2139_s1 + $0x880] sm:$0xff] }
  0xe2   :  { %v872_v45 = vadd.f32 %v584_v43, %v296_v42  ;;  %1158 = vst [vmem:[#allocation5 + $0x860] sm:$0xff] %v870_v40  ;;  %1159 = vst [vmem:[#allocation5 + $0x868] sm:$0xff] %v871_v41  ;;  %v873_v49 = vadd.f32 %v585_v46, %v297_v44  ;;  %v874_v50 = vadd.f32 %v586_v48, %v298_v47  ;;  %v299_v51 = vld [vmem:[#allocation2 + $0x888] sm:$0xff]  ;;  %v300_v53 = vld [vmem:[#allocation2 + $0x890] sm:$0xff] }
  0xe3   :  { %v587_v52 = vld [vmem:[%s2139_s1 + $0x888] sm:$0xff]  ;;  %v588_v55 = vld [vmem:[%s2139_s1 + $0x890] sm:$0xff]  ;;  %v301_v56 = vld [vmem:[#allocation2 + $0x898] sm:$0xff] }
  0xe4   :  { %1160 = vst [vmem:[#allocation5 + $0x870] sm:$0xff] %v872_v45  ;;  %v875_v54 = vadd.f32 %v587_v52, %v299_v51  ;;  %v589_v57 = vld [vmem:[%s2139_s1 + $0x898] sm:$0xff]  ;;  %1161 = vst [vmem:[#allocation5 + $0x878] sm:$0xff] %v873_v49  ;;  %v876_v58 = vadd.f32 %v588_v55, %v300_v53  ;;  %v302_v60 = vld [vmem:[#allocation2 + $0x8a0] sm:$0xff] }
  0xe5   :  { %1162 = vst [vmem:[#allocation5 + $0x880] sm:$0xff] %v874_v50  ;;  %v877_v59 = vadd.f32 %v589_v57, %v301_v56  ;;  %v590_v61 = vld [vmem:[%s2139_s1 + $0x8a0] sm:$0xff]  ;;  %v303_v62 = vld [vmem:[#allocation2 + $0x8a8] sm:$0xff]  ;;  %v304_v1 = vld [vmem:[#allocation2 + $0x8b0] sm:$0xff] }
  0xe6   :  { %1163 = vst [vmem:[#allocation5 + $0x888] sm:$0xff] %v875_v54  ;;  %v878_v63 = vadd.f32 %v590_v61, %v302_v60  ;;  %v591_v0 = vld [vmem:[%s2139_s1 + $0x8a8] sm:$0xff]  ;;  %v592_v2 = vld [vmem:[%s2139_s1 + $0x8b0] sm:$0xff]  ;;  %1164 = vst [vmem:[#allocation5 + $0x890] sm:$0xff] %v876_v58 }
  0xe7   :  { %1165 = vst [vmem:[#allocation5 + $0x898] sm:$0xff] %v877_v59  ;;  %v879_v3 = vadd.f32 %v591_v0, %v303_v62  ;;  %v880_v4 = vadd.f32 %v592_v2, %v304_v1  ;;  %v305_v5 = vld [vmem:[#allocation2 + $0x8b8] sm:$0xff]  ;;  %v306_v7 = vld [vmem:[#allocation2 + $0x8c0] sm:$0xff]  ;;  %v307_v10 = vld [vmem:[#allocation2 + $0x8c8] sm:$0xff] }
  0xe8   :  { %v593_v6 = vld [vmem:[%s2139_s1 + $0x8b8] sm:$0xff]  ;;  %1166 = vst [vmem:[#allocation5 + $0x8a0] sm:$0xff] %v878_v63  ;;  %v594_v9 = vld [vmem:[%s2139_s1 + $0x8c0] sm:$0xff]  ;;  %v595_v11 = vld [vmem:[%s2139_s1 + $0x8c8] sm:$0xff] }
  0xe9   :  { %v881_v8 = vadd.f32 %v593_v6, %v305_v5  ;;  %1167 = vst [vmem:[#allocation5 + $0x8a8] sm:$0xff] %v879_v3  ;;  %1168 = vst [vmem:[#allocation5 + $0x8b0] sm:$0xff] %v880_v4  ;;  %v882_v12 = vadd.f32 %v594_v9, %v306_v7  ;;  %v883_v13 = vadd.f32 %v595_v11, %v307_v10  ;;  %v308_v14 = vld [vmem:[#allocation2 + $0x8d0] sm:$0xff]  ;;  %v309_v16 = vld [vmem:[#allocation2 + $0x8d8] sm:$0xff] }
  0xea   :  { %v596_v15 = vld [vmem:[%s2139_s1 + $0x8d0] sm:$0xff]  ;;  %v597_v18 = vld [vmem:[%s2139_s1 + $0x8d8] sm:$0xff]  ;;  %v310_v19 = vld [vmem:[#allocation2 + $0x8e0] sm:$0xff] }
  0xeb   :  { %1169 = vst [vmem:[#allocation5 + $0x8b8] sm:$0xff] %v881_v8  ;;  %v884_v17 = vadd.f32 %v596_v15, %v308_v14  ;;  %v598_v20 = vld [vmem:[%s2139_s1 + $0x8e0] sm:$0xff]  ;;  %1170 = vst [vmem:[#allocation5 + $0x8c0] sm:$0xff] %v882_v12  ;;  %v885_v21 = vadd.f32 %v597_v18, %v309_v16  ;;  %v311_v23 = vld [vmem:[#allocation2 + $0x8e8] sm:$0xff] }
  0xec   :  { %1171 = vst [vmem:[#allocation5 + $0x8c8] sm:$0xff] %v883_v13  ;;  %v886_v22 = vadd.f32 %v598_v20, %v310_v19  ;;  %v599_v24 = vld [vmem:[%s2139_s1 + $0x8e8] sm:$0xff]  ;;  %v312_v25 = vld [vmem:[#allocation2 + $0x8f0] sm:$0xff]  ;;  %v313_v28 = vld [vmem:[#allocation2 + $0x8f8] sm:$0xff] }
  0xed   :  { %1172 = vst [vmem:[#allocation5 + $0x8d0] sm:$0xff] %v884_v17  ;;  %v887_v26 = vadd.f32 %v599_v24, %v311_v23  ;;  %v600_v27 = vld [vmem:[%s2139_s1 + $0x8f0] sm:$0xff]  ;;  %v601_v29 = vld [vmem:[%s2139_s1 + $0x8f8] sm:$0xff]  ;;  %1173 = vst [vmem:[#allocation5 + $0x8d8] sm:$0xff] %v885_v21 }
  0xee   :  { %1174 = vst [vmem:[#allocation5 + $0x8e0] sm:$0xff] %v886_v22  ;;  %v888_v30 = vadd.f32 %v600_v27, %v312_v25  ;;  %v889_v31 = vadd.f32 %v601_v29, %v313_v28 }
  0xef   :  { %1175 = vst [vmem:[#allocation5 + $0x8e8] sm:$0xff] %v887_v26 }
  0xf0   :  { %1176 = vst [vmem:[#allocation5 + $0x8f0] sm:$0xff] %v888_v30  ;;  %1177 = vst [vmem:[#allocation5 + $0x8f8] sm:$0xff] %v889_v31 }
  0xf1   :  { %1230 = shalt.err (!%p1227_p9)
}
  0xf2   :  { %1189 = dma.vmem_to_hbm [thread:$0]  %s1184_s20, 36864, %s2140_s2, [#allocation4], %s1244_s12, %s1244_s12, %s1245_s13  }
  0xf3   :  { %1241 = dma.done.wait [#allocation4], 36864  }
  0xf4   :  { %1242 = vsyncadd [#allocation4], 4294930432 }
  0xf5   :  { %1193 = vsyncpa [#allocation3], 1 }
  0xf6   :  { %1194 = vsyncpa [#allocation4], 1 }

</bundles_post_ra>
